<compile_context>
chip_gen: v6e
topology: v6e:2x2x1
jax: 0.10.0
libtpu: 0.0.40
codegen_flags: <defaults>
</compile_context>

<pallas_src>
import math
import numpy as np
import jax
import jax.numpy as jnp
from jax.experimental import pallas as pl
from jax.experimental.pallas import tpu as pltpu

LOCAL_SIZE = 5
LS2 = LOCAL_SIZE * LOCAL_SIZE
LOCAL_WEIGHT = 0.5
BN_EPS = 1e-5
G_MARGIN = 128            # lane-aligned left margin of the padded-flat layout


def _round_up(v, m):
    return ((v + m - 1) // m) * m


# ---------------------------------------------------------------------------
# Fully fused kernel (one grid step = one image)
# ---------------------------------------------------------------------------
def _make_fused_kernel(c1, c1p, c_p, c2, h, w, add):
    hp, wp = h + 2, w + 2
    sp = hp * wp
    g = wp + 1
    spp = _round_up(sp, 128)          # lane-dense conv width
    G = G_MARGIN
    mp = G + spp + 128                # scratch width (margins readable by taps)
    hw = h * w
    # tap window start offsets inside the padded-flat scratch
    offs = [G - g + kh * wp + kw for kh in range(3) for kw in range(3)]

    def kernel(x_ref, w1_ref, s1_ref, b1_ref, w2_ref, s2_ref, b2_ref,
               mask_ref, pd_ref, up_ref, gm_ref, bg_ref, o_ref,
               xl_ref, y1_ref, pt_ref):
        # ---- stage 0: build padded-flat bf16 x layout in VMEM (no XLA prep)
        xl_ref[...] = jnp.zeros((c1p, mp), jnp.bfloat16)
        xb = x_ref[0].astype(jnp.bfloat16)                       # (c1, hw)
        if c1p > c1:
            xb = jnp.concatenate(
                [xb, jnp.zeros((c1p - c1, hw), jnp.bfloat16)], axis=0)
        for r in range(h):
            dst = G + (r + 1) * wp + 1
            xl_ref[:, dst:dst + w] = xb[:, r * w:(r + 1) * w]

        # zero only the margins of the y1 scratch (its image area is fully
        # overwritten below); VMEM-only, a few KB per step.
        y1_ref[:, 0:G] = jnp.zeros((c_p, G), jnp.bfloat16)
        y1_ref[:, G + spp:mp] = jnp.zeros((c_p, mp - G - spp), jnp.bfloat16)

        mask = mask_ref[...]                                     # (1, spp)

        def conv3x3(src_ref, w_ref, s_ref, b_ref, cin_p):
            # fused im2col: 9 constant-lane-shift copies -> one K=9*cin matmul
            for t, off in enumerate(offs):
                pt_ref[t * cin_p:(t + 1) * cin_p, :] = src_ref[:, off:off + spp]
            acc = jnp.dot(w_ref[...], pt_ref[0:9 * cin_p, :],
                          preferred_element_type=jnp.float32)
            z = acc * s_ref[...] + b_ref[...]                    # folded BN
            return z * jax.nn.sigmoid(z)                         # SiLU

        # ---- cv1 : Conv3x3 + BN + SiLU  (padded layout kept in VMEM) -------
        y1 = conv3x3(xl_ref, w1_ref, s1_ref, b1_ref, c1p) * mask  # zero ring
        y1_ref[:, G:G + spp] = y1.astype(jnp.bfloat16)

        # ---- cv2 : Conv3x3 + BN + SiLU  (stays f32 for the MLCA path) ------
        y2 = conv3x3(y1_ref, w2_ref, s2_ref, b2_ref, c_p)        # (c2, spp)

        # ---- MLCA -----------------------------------------------------------
        # exact adaptive 5x5 pool (f32 matrices) + global mean
        lf = jnp.dot(y2, pd_ref[...], preferred_element_type=jnp.float32)
        gv = jnp.mean(lf, axis=1, keepdims=True)                 # (c2, 1)

        # interleaved (spatial-major) Conv1d gate as banded matmuls
        lf_next = jnp.concatenate(
            [lf[:, 1:], jnp.zeros((c2, 1), jnp.float32)], axis=1)
        lf_prev = jnp.concatenate(
            [jnp.zeros((c2, 1), jnp.float32), lf[:, :-1]], axis=1)
        y_local = (jnp.dot(gm_ref[0], lf, preferred_element_type=jnp.float32)
                   + jnp.dot(gm_ref[1], lf_next,
                             preferred_element_type=jnp.float32)
                   + jnp.dot(gm_ref[2], lf_prev,
                             preferred_element_type=jnp.float32))
        # channel-sequence Conv1d gate (broadcast over the 25 pooled cells)
        y_global = jnp.dot(bg_ref[...], jnp.broadcast_to(gv, (c2, LS2)),
                           preferred_element_type=jnp.float32)

        att5 = (jax.nn.sigmoid(y_global) * (1.0 - LOCAL_WEIGHT)
                + jax.nn.sigmoid(y_local) * LOCAL_WEIGHT)        # (c2, 25)
        att = jnp.dot(att5, up_ref[...],
                      preferred_element_type=jnp.float32)        # (c2, spp)
        prod = y2 * att

        # ---- un-pad to (c2, h*w), f32 residual from original x, store ------
        for r in range(h):
            src = (r + 1) * wp + 1
            piece = prod[:, src:src + w]
            if add:
                piece = piece + x_ref[0, :, r * w:(r + 1) * w]
            o_ref[0, :, r * w:(r + 1) * w] = piece

    return kernel


# ---------------------------------------------------------------------------
# Wrapper
# ---------------------------------------------------------------------------
def bottleneck_forward(x, params):
    n, c1, h, w = x.shape
    c2 = params["c2"]
    c1p, c_p = params["c1p"], params["c_p"]
    add = params["add"] and (c1 == c2)

    hp, wp = h + 2, w + 2
    sp = hp * wp
    spp = _round_up(sp, 128)
    mp = G_MARGIN + spp + 128
    hw = h * w
    cmaxp = max(c1p, c_p)
    assert wp + 1 <= G_MARGIN, "spatial width too large for the fixed margin"

    kernel = _make_fused_kernel(c1, c1p, c_p, c2, h, w, add)
    x_flat = x.reshape(n, c1, hw)                    # free reshape

    out_flat = pl.pallas_call(
        kernel,
        out_shape=jax.ShapeDtypeStruct((n, c2, hw), jnp.float32),
        grid=(n,),
        in_specs=[
            pl.BlockSpec((1, c1, hw), lambda i: (i, 0, 0)),     # x (f32)
            pl.BlockSpec((c_p, 9 * c1p), lambda i: (0, 0)),     # w1 packed
            pl.BlockSpec((c_p, 1), lambda i: (0, 0)),           # bn1 scale
            pl.BlockSpec((c_p, 1), lambda i: (0, 0)),           # bn1 bias
            pl.BlockSpec((c2, 9 * c_p), lambda i: (0, 0)),      # w2 packed
            pl.BlockSpec((c2, 1), lambda i: (0, 0)),            # bn2 scale
            pl.BlockSpec((c2, 1), lambda i: (0, 0)),            # bn2 bias
            pl.BlockSpec((1, spp), lambda i: (0, 0)),           # interior mask
            pl.BlockSpec((spp, LS2), lambda i: (0, 0)),         # pool down
            pl.BlockSpec((LS2, spp), lambda i: (0, 0)),         # pool up
            pl.BlockSpec((3, c2, c2), lambda i: (0, 0, 0)),     # local gate
            pl.BlockSpec((c2, c2), lambda i: (0, 0)),           # global gate
        ],
        out_specs=pl.BlockSpec((1, c2, hw), lambda i: (i, 0, 0)),
        scratch_shapes=[
            pltpu.VMEM((c1p, mp), jnp.bfloat16),     # padded-flat x
            pltpu.VMEM((c_p, mp), jnp.bfloat16),     # padded-flat y1
            pltpu.VMEM((9 * cmaxp, spp), jnp.bfloat16),  # im2col patches
        ],
        compiler_params=pltpu.CompilerParams(
            dimension_semantics=("parallel",)),      # megacore over batch
    )(x_flat, params["w1"], params["s1"], params["b1"],
      params["w2"], params["s2"], params["b2"],
      params["mask"], params["pool_down"], params["pool_up"],
      params["gate_local"], params["gate_global"])

    return out_flat.reshape(n, c2, h, w)


# ---------------------------------------------------------------------------
# Deterministic parameter construction (BN folded, inference mode)
# ---------------------------------------------------------------------------
def adaptive_pool_matrix(in_size, out_size):
    """Exact PyTorch adaptive_avg_pool1d as a linear map (out_size, in_size)."""
    m = np.zeros((out_size, in_size), dtype=np.float32)
    for o in range(out_size):
        s = (o * in_size) // out_size
        e = -((-(o + 1) * in_size) // out_size)      # ceil
        m[o, s:e] = 1.0 / (e - s)
    return m


def make_params(c1, c2, h, w, shortcut=True, e=0.5):
    c_ = max(1, int(c2 * e))
    c1p = _round_up(c1, 16)
    c_p = _round_up(c_, 16)
    hp, wp = h + 2, w + 2
    sp = hp * wp
    spp = _round_up(sp, 128)
    assert wp + 1 <= G_MARGIN

    key = jax.random.PRNGKey(42)
    ks = jax.random.split(key, 12)

    def bn_fold(kg, kb, km, kv, c):
        gamma = 1.0 + 0.1 * jax.random.normal(kg, (c,), jnp.float32)
        beta = 0.05 * jax.random.normal(kb, (c,), jnp.float32)
        mean = 0.05 * jax.random.normal(km, (c,), jnp.float32)
        var = 1.0 + 0.1 * jnp.abs(jax.random.normal(kv, (c,), jnp.float32))
        scale = gamma / jnp.sqrt(var + BN_EPS)
        bias = beta - mean * scale
        return np.asarray(scale), np.asarray(bias)

    # MLCA Conv1d kernel size (module's formula, in_size=c2, gamma=2, b=1)
    t0 = int(abs(math.log(c2, 2) + 1) / 2)
    k1d = t0 if t0 % 2 else t0 + 1
    p1d = (k1d - 1) // 2
    assert p1d < c2 and p1d < LS2

    w1 = np.asarray(0.1 * jax.random.normal(ks[0], (c_, c1, 3, 3), jnp.float32))
    w2 = np.asarray(0.1 * jax.random.normal(ks[1], (c2, c_, 3, 3), jnp.float32))
    bn1_scale, bn1_bias = bn_fold(ks[2], ks[3], ks[4], ks[5], c_)
    bn2_scale, bn2_bias = bn_fold(ks[6], ks[7], ks[8], ks[9], c2)
    wl = np.asarray(0.5 * jax.random.normal(ks[10], (k1d,), jnp.float32))
    wg = np.asarray(0.5 * jax.random.normal(ks[11], (k1d,), jnp.float32))

    # packed conv weights: column t*cin_p + ci  <->  tap t = kh*3+kw, channel ci
    w1_packed = np.zeros((c_p, 9 * c1p), np.float32)
    w2_packed = np.zeros((c2, 9 * c_p), np.float32)
    for tp in range(9):
        kh, kw = divmod(tp, 3)
        w1_packed[:c_, tp * c1p:tp * c1p + c1] = w1[:, :, kh, kw]
        w2_packed[:, tp * c_p:tp * c_p + c_] = w2[:, :, kh, kw]

    s1 = np.zeros((c_p, 1), np.float32); s1[:c_, 0] = bn1_scale
    b1 = np.zeros((c_p, 1), np.float32); b1[:c_, 0] = bn1_bias
    s2 = bn2_scale.reshape(c2, 1).astype(np.float32)
    b2 = bn2_bias.reshape(c2, 1).astype(np.float32)

    # exact adaptive-avg-pool maps (H and W handled separately), kept f32
    qh = adaptive_pool_matrix(h, LOCAL_SIZE)         # (5, H)
    qw = adaptive_pool_matrix(w, LOCAL_SIZE)         # (5, W)
    uh = adaptive_pool_matrix(LOCAL_SIZE, h)         # (H, 5)
    uw = adaptive_pool_matrix(LOCAL_SIZE, w)         # (W, 5)
    down_hw = np.einsum("ph,qw->pqhw", qh, qw).reshape(LS2, h * w).T
    up_hw = np.einsum("hp,wq->pqhw", uh, uw).reshape(LS2, h * w)

    # embed spatial maps into the padded-flat layout (interior positions)
    pos = ((np.arange(h)[:, None] + 1) * wp
           + (np.arange(w)[None, :] + 1)).reshape(-1)
    pool_down = np.zeros((spp, LS2), np.float32); pool_down[pos, :] = down_hw
    pool_up = np.zeros((LS2, spp), np.float32);   pool_up[:, pos] = up_hw
    mask = np.zeros((1, spp), np.float32); mask[0, pos] = 1.0

    # MLCA local gate: interleaved-sequence Conv1d as banded channel matrices
    m0 = np.zeros((c2, c2), np.float32)
    mplus = np.zeros((c2, c2), np.float32)
    mminus = np.zeros((c2, c2), np.float32)
    for ch in range(c2):
        for j in range(k1d):
            e_ = ch + j - p1d
            if 0 <= e_ < c2:
                m0[ch, e_] += wl[j]
            elif e_ >= c2:
                mplus[ch, e_ - c2] += wl[j]      # pairs with next spatial cell
            else:
                mminus[ch, e_ + c2] += wl[j]     # pairs with prev spatial cell
    # MLCA global gate: Conv1d over the channel sequence as a banded matrix
    bg = np.zeros((c2, c2), np.float32)
    for ch in range(c2):
        for j in range(k1d):
            cc = ch + j - p1d
            if 0 <= cc < c2:
                bg[ch, cc] += wg[j]

    return {
        "c2": c2, "c1p": c1p, "c_p": c_p,
        "w1": jnp.asarray(w1_packed, jnp.bfloat16),
        "w2": jnp.asarray(w2_packed, jnp.bfloat16),
        "s1": jnp.asarray(s1), "b1": jnp.asarray(b1),
        "s2": jnp.asarray(s2), "b2": jnp.asarray(b2),
        "mask": jnp.asarray(mask),
        "pool_down": jnp.asarray(pool_down),
        "pool_up": jnp.asarray(pool_up),
        "gate_local": jnp.asarray(np.stack([m0, mplus, mminus])),
        "gate_global": jnp.asarray(bg),
        "add": bool(shortcut and (c1 == c2)),
    }


# ---------------------------------------------------------------------------
if __name__ == "__main__":
    N, C1, C2, H, W = 2, 8, 8, 16, 16
    x = jax.random.normal(jax.random.PRNGKey(0), (N, C1, H, W), jnp.float32)
    params = make_params(C1, C2, H, W, shortcut=True, e=0.5)

    fwd = jax.jit(lambda a: bottleneck_forward(a, params))
    out = fwd(x)
    jax.block_until_ready(out)
    assert out.shape == (N, C2, H, W), out.shape
    assert bool(jnp.all(jnp.isfinite(out)))
    print("KERNEL_OK")
</pallas_src>

<mosaic_0001>
module attributes {stable_mosaic.version = 11 : i64} {
  func.func @kernel(%arg0: i32, %arg1: memref<1x8x256xf32, #tpu.memory_space<vmem>>, %arg2: memref<16x144xbf16, #tpu.memory_space<vmem>>, %arg3: memref<16x1xf32, #tpu.memory_space<vmem>>, %arg4: memref<16x1xf32, #tpu.memory_space<vmem>>, %arg5: memref<8x144xbf16, #tpu.memory_space<vmem>>, %arg6: memref<8x1xf32, #tpu.memory_space<vmem>>, %arg7: memref<8x1xf32, #tpu.memory_space<vmem>>, %arg8: memref<1x384xf32, #tpu.memory_space<vmem>>, %arg9: memref<384x25xf32, #tpu.memory_space<vmem>>, %arg10: memref<25x384xf32, #tpu.memory_space<vmem>>, %arg11: memref<3x8x8xf32, #tpu.memory_space<vmem>>, %arg12: memref<8x8xf32, #tpu.memory_space<vmem>>, %arg13: memref<1x8x256xf32, #tpu.memory_space<vmem>>, %arg14: memref<16x640xbf16, #tpu.memory_space<vmem>>, %arg15: memref<16x640xbf16, #tpu.memory_space<vmem>>, %arg16: memref<144x384xbf16, #tpu.memory_space<vmem>>) attributes {dimension_semantics = [#tpu.dimension_semantics<parallel>], iteration_bounds = array<i64: 2>, scalar_prefetch = 0 : i64, scratch_operands = 3 : i64, tpu.core_type = #tpu.core_type<tc>, window_params = [{transform_indices = @transform_0, window_bounds = array<i64: 1, 8, 256>}, {pipeline_mode = #tpu.pipeline_mode<synchronous>, transform_indices = @transform_1, window_bounds = array<i64: 16, 144>}, {pipeline_mode = #tpu.pipeline_mode<synchronous>, transform_indices = @transform_2, window_bounds = array<i64: 16, 1>}, {pipeline_mode = #tpu.pipeline_mode<synchronous>, transform_indices = @transform_3, window_bounds = array<i64: 16, 1>}, {pipeline_mode = #tpu.pipeline_mode<synchronous>, transform_indices = @transform_4, window_bounds = array<i64: 8, 144>}, {pipeline_mode = #tpu.pipeline_mode<synchronous>, transform_indices = @transform_5, window_bounds = array<i64: 8, 1>}, {pipeline_mode = #tpu.pipeline_mode<synchronous>, transform_indices = @transform_6, window_bounds = array<i64: 8, 1>}, {pipeline_mode = #tpu.pipeline_mode<synchronous>, transform_indices = @transform_7, window_bounds = array<i64: 1, 384>}, {pipeline_mode = #tpu.pipeline_mode<synchronous>, transform_indices = @transform_8, window_bounds = array<i64: 384, 25>}, {pipeline_mode = #tpu.pipeline_mode<synchronous>, transform_indices = @transform_9, window_bounds = array<i64: 25, 384>}, {pipeline_mode = #tpu.pipeline_mode<synchronous>, transform_indices = @transform_10, window_bounds = array<i64: 3, 8, 8>}, {pipeline_mode = #tpu.pipeline_mode<synchronous>, transform_indices = @transform_11, window_bounds = array<i64: 8, 8>}, {transform_indices = @transform_12, window_bounds = array<i64: 1, 8, 256>}]} {
    %cst = arith.constant 0.000000e+00 : bf16
    %0 = vector.broadcast %cst : bf16 to vector<16x640xbf16>
    %c0 = arith.constant 0 : index
    %c0_0 = arith.constant 0 : index
    %1 = vector.load %arg14[%c0, %c0_0] : memref<16x640xbf16, #tpu.memory_space<vmem>>, vector<16x640xbf16>
    tpu.vector_store %arg14[%c0, %c0_0], %0 {strides = array<i32>} : memref<16x640xbf16, #tpu.memory_space<vmem>>, vector<16x640xbf16>,
    %c0_1 = arith.constant 0 : index
    %c0_2 = arith.constant 0 : index
    %c0_3 = arith.constant 0 : index
    %2 = vector.load %arg1[%c0_1, %c0_2, %c0_3] : memref<1x8x256xf32, #tpu.memory_space<vmem>>, vector<1x8x256xf32>
    %3 = vector.shape_cast %2 : vector<1x8x256xf32> to vector<8x256xf32>
    %4 = arith.truncf %3 : vector<8x256xf32> to vector<8x256xbf16>
    %cst_4 = arith.constant 0.000000e+00 : bf16
    %5 = vector.broadcast %cst_4 : bf16 to vector<8x256xbf16>
    %6 = tpu.concatenate %4, %5 in 0 : vector<8x256xbf16>, vector<8x256xbf16> -> vector<16x256xbf16>
    %7 = vector.extract_strided_slice %6 {offsets = [0, 0], sizes = [16, 16], strides = [1, 1]} : vector<16x256xbf16> to vector<16x16xbf16>
    %c0_5 = arith.constant 0 : index
    %c147 = arith.constant 147 : index
    %8 = vector.load %arg14[%c0_5, %c147] : memref<16x640xbf16, #tpu.memory_space<vmem>>, vector<16x16xbf16>
    tpu.vector_store %arg14[%c0_5, %c147], %7 {strides = array<i32>} : memref<16x640xbf16, #tpu.memory_space<vmem>>, vector<16x16xbf16>,
    %9 = vector.extract_strided_slice %6 {offsets = [0, 16], sizes = [16, 16], strides = [1, 1]} : vector<16x256xbf16> to vector<16x16xbf16>
    %c0_6 = arith.constant 0 : index
    %c165 = arith.constant 165 : index
    %10 = vector.load %arg14[%c0_6, %c165] : memref<16x640xbf16, #tpu.memory_space<vmem>>, vector<16x16xbf16>
    tpu.vector_store %arg14[%c0_6, %c165], %9 {strides = array<i32>} : memref<16x640xbf16, #tpu.memory_space<vmem>>, vector<16x16xbf16>,
    %11 = vector.extract_strided_slice %6 {offsets = [0, 32], sizes = [16, 16], strides = [1, 1]} : vector<16x256xbf16> to vector<16x16xbf16>
    %c0_7 = arith.constant 0 : index
    %c183 = arith.constant 183 : index
    %12 = vector.load %arg14[%c0_7, %c183] : memref<16x640xbf16, #tpu.memory_space<vmem>>, vector<16x16xbf16>
    tpu.vector_store %arg14[%c0_7, %c183], %11 {strides = array<i32>} : memref<16x640xbf16, #tpu.memory_space<vmem>>, vector<16x16xbf16>,
    %13 = vector.extract_strided_slice %6 {offsets = [0, 48], sizes = [16, 16], strides = [1, 1]} : vector<16x256xbf16> to vector<16x16xbf16>
    %c0_8 = arith.constant 0 : index
    %c201 = arith.constant 201 : index
    %14 = vector.load %arg14[%c0_8, %c201] : memref<16x640xbf16, #tpu.memory_space<vmem>>, vector<16x16xbf16>
    tpu.vector_store %arg14[%c0_8, %c201], %13 {strides = array<i32>} : memref<16x640xbf16, #tpu.memory_space<vmem>>, vector<16x16xbf16>,
    %15 = vector.extract_strided_slice %6 {offsets = [0, 64], sizes = [16, 16], strides = [1, 1]} : vector<16x256xbf16> to vector<16x16xbf16>
    %c0_9 = arith.constant 0 : index
    %c219 = arith.constant 219 : index
    %16 = vector.load %arg14[%c0_9, %c219] : memref<16x640xbf16, #tpu.memory_space<vmem>>, vector<16x16xbf16>
    tpu.vector_store %arg14[%c0_9, %c219], %15 {strides = array<i32>} : memref<16x640xbf16, #tpu.memory_space<vmem>>, vector<16x16xbf16>,
    %17 = vector.extract_strided_slice %6 {offsets = [0, 80], sizes = [16, 16], strides = [1, 1]} : vector<16x256xbf16> to vector<16x16xbf16>
    %c0_10 = arith.constant 0 : index
    %c237 = arith.constant 237 : index
    %18 = vector.load %arg14[%c0_10, %c237] : memref<16x640xbf16, #tpu.memory_space<vmem>>, vector<16x16xbf16>
    tpu.vector_store %arg14[%c0_10, %c237], %17 {strides = array<i32>} : memref<16x640xbf16, #tpu.memory_space<vmem>>, vector<16x16xbf16>,
    %19 = vector.extract_strided_slice %6 {offsets = [0, 96], sizes = [16, 16], strides = [1, 1]} : vector<16x256xbf16> to vector<16x16xbf16>
    %c0_11 = arith.constant 0 : index
    %c255 = arith.constant 255 : index
    %20 = vector.load %arg14[%c0_11, %c255] : memref<16x640xbf16, #tpu.memory_space<vmem>>, vector<16x16xbf16>
    tpu.vector_store %arg14[%c0_11, %c255], %19 {strides = array<i32>} : memref<16x640xbf16, #tpu.memory_space<vmem>>, vector<16x16xbf16>,
    %21 = vector.extract_strided_slice %6 {offsets = [0, 112], sizes = [16, 16], strides = [1, 1]} : vector<16x256xbf16> to vector<16x16xbf16>
    %c0_12 = arith.constant 0 : index
    %c273 = arith.constant 273 : index
    %22 = vector.load %arg14[%c0_12, %c273] : memref<16x640xbf16, #tpu.memory_space<vmem>>, vector<16x16xbf16>
    tpu.vector_store %arg14[%c0_12, %c273], %21 {strides = array<i32>} : memref<16x640xbf16, #tpu.memory_space<vmem>>, vector<16x16xbf16>,
    %23 = vector.extract_strided_slice %6 {offsets = [0, 128], sizes = [16, 16], strides = [1, 1]} : vector<16x256xbf16> to vector<16x16xbf16>
    %c0_13 = arith.constant 0 : index
    %c291 = arith.constant 291 : index
    %24 = vector.load %arg14[%c0_13, %c291] : memref<16x640xbf16, #tpu.memory_space<vmem>>, vector<16x16xbf16>
    tpu.vector_store %arg14[%c0_13, %c291], %23 {strides = array<i32>} : memref<16x640xbf16, #tpu.memory_space<vmem>>, vector<16x16xbf16>,
    %25 = vector.extract_strided_slice %6 {offsets = [0, 144], sizes = [16, 16], strides = [1, 1]} : vector<16x256xbf16> to vector<16x16xbf16>
    %c0_14 = arith.constant 0 : index
    %c309 = arith.constant 309 : index
    %26 = vector.load %arg14[%c0_14, %c309] : memref<16x640xbf16, #tpu.memory_space<vmem>>, vector<16x16xbf16>
    tpu.vector_store %arg14[%c0_14, %c309], %25 {strides = array<i32>} : memref<16x640xbf16, #tpu.memory_space<vmem>>, vector<16x16xbf16>,
    %27 = vector.extract_strided_slice %6 {offsets = [0, 160], sizes = [16, 16], strides = [1, 1]} : vector<16x256xbf16> to vector<16x16xbf16>
    %c0_15 = arith.constant 0 : index
    %c327 = arith.constant 327 : index
    %28 = vector.load %arg14[%c0_15, %c327] : memref<16x640xbf16, #tpu.memory_space<vmem>>, vector<16x16xbf16>
    tpu.vector_store %arg14[%c0_15, %c327], %27 {strides = array<i32>} : memref<16x640xbf16, #tpu.memory_space<vmem>>, vector<16x16xbf16>,
    %29 = vector.extract_strided_slice %6 {offsets = [0, 176], sizes = [16, 16], strides = [1, 1]} : vector<16x256xbf16> to vector<16x16xbf16>
    %c0_16 = arith.constant 0 : index
    %c345 = arith.constant 345 : index
    %30 = vector.load %arg14[%c0_16, %c345] : memref<16x640xbf16, #tpu.memory_space<vmem>>, vector<16x16xbf16>
    tpu.vector_store %arg14[%c0_16, %c345], %29 {strides = array<i32>} : memref<16x640xbf16, #tpu.memory_space<vmem>>, vector<16x16xbf16>,
    %31 = vector.extract_strided_slice %6 {offsets = [0, 192], sizes = [16, 16], strides = [1, 1]} : vector<16x256xbf16> to vector<16x16xbf16>
    %c0_17 = arith.constant 0 : index
    %c363 = arith.constant 363 : index
    %32 = vector.load %arg14[%c0_17, %c363] : memref<16x640xbf16, #tpu.memory_space<vmem>>, vector<16x16xbf16>
    tpu.vector_store %arg14[%c0_17, %c363], %31 {strides = array<i32>} : memref<16x640xbf16, #tpu.memory_space<vmem>>, vector<16x16xbf16>,
    %33 = vector.extract_strided_slice %6 {offsets = [0, 208], sizes = [16, 16], strides = [1, 1]} : vector<16x256xbf16> to vector<16x16xbf16>
    %c0_18 = arith.constant 0 : index
    %c381 = arith.constant 381 : index
    %34 = vector.load %arg14[%c0_18, %c381] : memref<16x640xbf16, #tpu.memory_space<vmem>>, vector<16x16xbf16>
    tpu.vector_store %arg14[%c0_18, %c381], %33 {strides = array<i32>} : memref<16x640xbf16, #tpu.memory_space<vmem>>, vector<16x16xbf16>,
    %35 = vector.extract_strided_slice %6 {offsets = [0, 224], sizes = [16, 16], strides = [1, 1]} : vector<16x256xbf16> to vector<16x16xbf16>
    %c0_19 = arith.constant 0 : index
    %c399 = arith.constant 399 : index
    %36 = vector.load %arg14[%c0_19, %c399] : memref<16x640xbf16, #tpu.memory_space<vmem>>, vector<16x16xbf16>
    tpu.vector_store %arg14[%c0_19, %c399], %35 {strides = array<i32>} : memref<16x640xbf16, #tpu.memory_space<vmem>>, vector<16x16xbf16>,
    %37 = vector.extract_strided_slice %6 {offsets = [0, 240], sizes = [16, 16], strides = [1, 1]} : vector<16x256xbf16> to vector<16x16xbf16>
    %c0_20 = arith.constant 0 : index
    %c417 = arith.constant 417 : index
    %38 = vector.load %arg14[%c0_20, %c417] : memref<16x640xbf16, #tpu.memory_space<vmem>>, vector<16x16xbf16>
    tpu.vector_store %arg14[%c0_20, %c417], %37 {strides = array<i32>} : memref<16x640xbf16, #tpu.memory_space<vmem>>, vector<16x16xbf16>,
    %cst_21 = arith.constant 0.000000e+00 : bf16
    %39 = vector.broadcast %cst_21 : bf16 to vector<16x128xbf16>
    %c0_22 = arith.constant 0 : index
    %c0_23 = arith.constant 0 : index
    %40 = vector.load %arg15[%c0_22, %c0_23] : memref<16x640xbf16, #tpu.memory_space<vmem>>, vector<16x128xbf16>
    tpu.vector_store %arg15[%c0_22, %c0_23], %39 {strides = array<i32>} : memref<16x640xbf16, #tpu.memory_space<vmem>>, vector<16x128xbf16>,
    %cst_24 = arith.constant 0.000000e+00 : bf16
    %41 = vector.broadcast %cst_24 : bf16 to vector<16x128xbf16>
    %c0_25 = arith.constant 0 : index
    %c512 = arith.constant 512 : index
    %42 = vector.load %arg15[%c0_25, %c512] : memref<16x640xbf16, #tpu.memory_space<vmem>>, vector<16x128xbf16>
    tpu.vector_store %arg15[%c0_25, %c512], %41 {strides = array<i32>} : memref<16x640xbf16, #tpu.memory_space<vmem>>, vector<16x128xbf16>,
    %c0_26 = arith.constant 0 : index
    %c0_27 = arith.constant 0 : index
    %43 = vector.load %arg8[%c0_26, %c0_27] : memref<1x384xf32, #tpu.memory_space<vmem>>, vector<1x384xf32>
    %c0_28 = arith.constant 0 : index
    %c109 = arith.constant 109 : index
    %44 = vector.load %arg14[%c0_28, %c109] : memref<16x640xbf16, #tpu.memory_space<vmem>>, vector<16x384xbf16>
    %c0_29 = arith.constant 0 : index
    %c0_30 = arith.constant 0 : index
    %45 = vector.load %arg16[%c0_29, %c0_30] : memref<144x384xbf16, #tpu.memory_space<vmem>>, vector<16x384xbf16>
    tpu.vector_store %arg16[%c0_29, %c0_30], %44 {strides = array<i32>} : memref<144x384xbf16, #tpu.memory_space<vmem>>, vector<16x384xbf16>,
    %c0_31 = arith.constant 0 : index
    %c110 = arith.constant 110 : index
    %46 = vector.load %arg14[%c0_31, %c110] : memref<16x640xbf16, #tpu.memory_space<vmem>>, vector<16x384xbf16>
    %c16 = arith.constant 16 : index
    %c0_32 = arith.constant 0 : index
    %47 = vector.load %arg16[%c16, %c0_32] : memref<144x384xbf16, #tpu.memory_space<vmem>>, vector<16x384xbf16>
    tpu.vector_store %arg16[%c16, %c0_32], %46 {strides = array<i32>} : memref<144x384xbf16, #tpu.memory_space<vmem>>, vector<16x384xbf16>,
    %c0_33 = arith.constant 0 : index
    %c111 = arith.constant 111 : index
    %48 = vector.load %arg14[%c0_33, %c111] : memref<16x640xbf16, #tpu.memory_space<vmem>>, vector<16x384xbf16>
    %c32 = arith.constant 32 : index
    %c0_34 = arith.constant 0 : index
    %49 = vector.load %arg16[%c32, %c0_34] : memref<144x384xbf16, #tpu.memory_space<vmem>>, vector<16x384xbf16>
    tpu.vector_store %arg16[%c32, %c0_34], %48 {strides = array<i32>} : memref<144x384xbf16, #tpu.memory_space<vmem>>, vector<16x384xbf16>,
    %c0_35 = arith.constant 0 : index
    %c127 = arith.constant 127 : index
    %50 = vector.load %arg14[%c0_35, %c127] : memref<16x640xbf16, #tpu.memory_space<vmem>>, vector<16x384xbf16>
    %c48 = arith.constant 48 : index
    %c0_36 = arith.constant 0 : index
    %51 = vector.load %arg16[%c48, %c0_36] : memref<144x384xbf16, #tpu.memory_space<vmem>>, vector<16x384xbf16>
    tpu.vector_store %arg16[%c48, %c0_36], %50 {strides = array<i32>} : memref<144x384xbf16, #tpu.memory_space<vmem>>, vector<16x384xbf16>,
    %c0_37 = arith.constant 0 : index
    %c128 = arith.constant 128 : index
    %52 = vector.load %arg14[%c0_37, %c128] : memref<16x640xbf16, #tpu.memory_space<vmem>>, vector<16x384xbf16>
    %c64 = arith.constant 64 : index
    %c0_38 = arith.constant 0 : index
    %53 = vector.load %arg16[%c64, %c0_38] : memref<144x384xbf16, #tpu.memory_space<vmem>>, vector<16x384xbf16>
    tpu.vector_store %arg16[%c64, %c0_38], %52 {strides = array<i32>} : memref<144x384xbf16, #tpu.memory_space<vmem>>, vector<16x384xbf16>,
    %c0_39 = arith.constant 0 : index
    %c129 = arith.constant 129 : index
    %54 = vector.load %arg14[%c0_39, %c129] : memref<16x640xbf16, #tpu.memory_space<vmem>>, vector<16x384xbf16>
    %c80 = arith.constant 80 : index
    %c0_40 = arith.constant 0 : index
    %55 = vector.load %arg16[%c80, %c0_40] : memref<144x384xbf16, #tpu.memory_space<vmem>>, vector<16x384xbf16>
    tpu.vector_store %arg16[%c80, %c0_40], %54 {strides = array<i32>} : memref<144x384xbf16, #tpu.memory_space<vmem>>, vector<16x384xbf16>,
    %c0_41 = arith.constant 0 : index
    %c145 = arith.constant 145 : index
    %56 = vector.load %arg14[%c0_41, %c145] : memref<16x640xbf16, #tpu.memory_space<vmem>>, vector<16x384xbf16>
    %c96 = arith.constant 96 : index
    %c0_42 = arith.constant 0 : index
    %57 = vector.load %arg16[%c96, %c0_42] : memref<144x384xbf16, #tpu.memory_space<vmem>>, vector<16x384xbf16>
    tpu.vector_store %arg16[%c96, %c0_42], %56 {strides = array<i32>} : memref<144x384xbf16, #tpu.memory_space<vmem>>, vector<16x384xbf16>,
    %c0_43 = arith.constant 0 : index
    %c146 = arith.constant 146 : index
    %58 = vector.load %arg14[%c0_43, %c146] : memref<16x640xbf16, #tpu.memory_space<vmem>>, vector<16x384xbf16>
    %c112 = arith.constant 112 : index
    %c0_44 = arith.constant 0 : index
    %59 = vector.load %arg16[%c112, %c0_44] : memref<144x384xbf16, #tpu.memory_space<vmem>>, vector<16x384xbf16>
    tpu.vector_store %arg16[%c112, %c0_44], %58 {strides = array<i32>} : memref<144x384xbf16, #tpu.memory_space<vmem>>, vector<16x384xbf16>,
    %c0_45 = arith.constant 0 : index
    %c147_46 = arith.constant 147 : index
    %60 = vector.load %arg14[%c0_45, %c147_46] : memref<16x640xbf16, #tpu.memory_space<vmem>>, vector<16x384xbf16>
    %c128_47 = arith.constant 128 : index
    %c0_48 = arith.constant 0 : index
    %61 = vector.load %arg16[%c128_47, %c0_48] : memref<144x384xbf16, #tpu.memory_space<vmem>>, vector<16x384xbf16>
    tpu.vector_store %arg16[%c128_47, %c0_48], %60 {strides = array<i32>} : memref<144x384xbf16, #tpu.memory_space<vmem>>, vector<16x384xbf16>,
    %c0_49 = arith.constant 0 : index
    %c0_50 = arith.constant 0 : index
    %62 = vector.load %arg2[%c0_49, %c0_50] : memref<16x144xbf16, #tpu.memory_space<vmem>>, vector<16x144xbf16>
    %c0_51 = arith.constant 0 : index
    %c0_52 = arith.constant 0 : index
    %63 = vector.load %arg16[%c0_51, %c0_52] : memref<144x384xbf16, #tpu.memory_space<vmem>>, vector<144x384xbf16>
    %cst_53 = arith.constant dense<0.000000e+00> : vector<16x384xf32>
    %64 = tpu.matmul %62, %63, %cst_53 {dimension_numbers = #tpu.dot_dimension_numbers<[1], [0], [0], [1], [0, 0, 1, 1], [], []>} : vector<16x144xbf16>, vector<144x384xbf16>, vector<16x384xf32> -> vector<16x384xf32>
    %c0_54 = arith.constant 0 : index
    %c0_55 = arith.constant 0 : index
    %65 = vector.load %arg3[%c0_54, %c0_55] : memref<16x1xf32, #tpu.memory_space<vmem>>, vector<16x1xf32>
    %66 = vector.broadcast %65 : vector<16x1xf32> to vector<16x384xf32>
    %67 = arith.mulf %64, %66 : vector<16x384xf32>
    %c0_56 = arith.constant 0 : index
    %c0_57 = arith.constant 0 : index
    %68 = vector.load %arg4[%c0_56, %c0_57] : memref<16x1xf32, #tpu.memory_space<vmem>>, vector<16x1xf32>
    %69 = vector.broadcast %68 : vector<16x1xf32> to vector<16x384xf32>
    %70 = arith.addf %67, %69 : vector<16x384xf32>
    %71 = arith.negf %70 : vector<16x384xf32>
    %72 = math.exp %71 : vector<16x384xf32>
    %cst_58 = arith.constant 1.000000e+00 : f32
    %73 = vector.broadcast %cst_58 : f32 to vector<16x384xf32>
    %74 = arith.addf %73, %72 : vector<16x384xf32>
    %75 = arith.divf %73, %74 : vector<16x384xf32>
    %76 = arith.mulf %70, %75 : vector<16x384xf32>
    %77 = vector.broadcast %43 : vector<1x384xf32> to vector<16x384xf32>
    %78 = arith.mulf %76, %77 : vector<16x384xf32>
    %79 = arith.truncf %78 : vector<16x384xf32> to vector<16x384xbf16>
    %c0_59 = arith.constant 0 : index
    %c128_60 = arith.constant 128 : index
    %80 = vector.load %arg15[%c0_59, %c128_60] : memref<16x640xbf16, #tpu.memory_space<vmem>>, vector<16x384xbf16>
    tpu.vector_store %arg15[%c0_59, %c128_60], %79 {strides = array<i32>} : memref<16x640xbf16, #tpu.memory_space<vmem>>, vector<16x384xbf16>,
    %c0_61 = arith.constant 0 : index
    %c109_62 = arith.constant 109 : index
    %81 = vector.load %arg15[%c0_61, %c109_62] : memref<16x640xbf16, #tpu.memory_space<vmem>>, vector<16x384xbf16>
    %c0_63 = arith.constant 0 : index
    %c0_64 = arith.constant 0 : index
    %82 = vector.load %arg16[%c0_63, %c0_64] : memref<144x384xbf16, #tpu.memory_space<vmem>>, vector<16x384xbf16>
    tpu.vector_store %arg16[%c0_63, %c0_64], %81 {strides = array<i32>} : memref<144x384xbf16, #tpu.memory_space<vmem>>, vector<16x384xbf16>,
    %c0_65 = arith.constant 0 : index
    %c110_66 = arith.constant 110 : index
    %83 = vector.load %arg15[%c0_65, %c110_66] : memref<16x640xbf16, #tpu.memory_space<vmem>>, vector<16x384xbf16>
    %c16_67 = arith.constant 16 : index
    %c0_68 = arith.constant 0 : index
    %84 = vector.load %arg16[%c16_67, %c0_68] : memref<144x384xbf16, #tpu.memory_space<vmem>>, vector<16x384xbf16>
    tpu.vector_store %arg16[%c16_67, %c0_68], %83 {strides = array<i32>} : memref<144x384xbf16, #tpu.memory_space<vmem>>, vector<16x384xbf16>,
    %c0_69 = arith.constant 0 : index
    %c111_70 = arith.constant 111 : index
    %85 = vector.load %arg15[%c0_69, %c111_70] : memref<16x640xbf16, #tpu.memory_space<vmem>>, vector<16x384xbf16>
    %c32_71 = arith.constant 32 : index
    %c0_72 = arith.constant 0 : index
    %86 = vector.load %arg16[%c32_71, %c0_72] : memref<144x384xbf16, #tpu.memory_space<vmem>>, vector<16x384xbf16>
    tpu.vector_store %arg16[%c32_71, %c0_72], %85 {strides = array<i32>} : memref<144x384xbf16, #tpu.memory_space<vmem>>, vector<16x384xbf16>,
    %c0_73 = arith.constant 0 : index
    %c127_74 = arith.constant 127 : index
    %87 = vector.load %arg15[%c0_73, %c127_74] : memref<16x640xbf16, #tpu.memory_space<vmem>>, vector<16x384xbf16>
    %c48_75 = arith.constant 48 : index
    %c0_76 = arith.constant 0 : index
    %88 = vector.load %arg16[%c48_75, %c0_76] : memref<144x384xbf16, #tpu.memory_space<vmem>>, vector<16x384xbf16>
    tpu.vector_store %arg16[%c48_75, %c0_76], %87 {strides = array<i32>} : memref<144x384xbf16, #tpu.memory_space<vmem>>, vector<16x384xbf16>,
    %c0_77 = arith.constant 0 : index
    %c128_78 = arith.constant 128 : index
    %89 = vector.load %arg15[%c0_77, %c128_78] : memref<16x640xbf16, #tpu.memory_space<vmem>>, vector<16x384xbf16>
    %c64_79 = arith.constant 64 : index
    %c0_80 = arith.constant 0 : index
    %90 = vector.load %arg16[%c64_79, %c0_80] : memref<144x384xbf16, #tpu.memory_space<vmem>>, vector<16x384xbf16>
    tpu.vector_store %arg16[%c64_79, %c0_80], %89 {strides = array<i32>} : memref<144x384xbf16, #tpu.memory_space<vmem>>, vector<16x384xbf16>,
    %c0_81 = arith.constant 0 : index
    %c129_82 = arith.constant 129 : index
    %91 = vector.load %arg15[%c0_81, %c129_82] : memref<16x640xbf16, #tpu.memory_space<vmem>>, vector<16x384xbf16>
    %c80_83 = arith.constant 80 : index
    %c0_84 = arith.constant 0 : index
    %92 = vector.load %arg16[%c80_83, %c0_84] : memref<144x384xbf16, #tpu.memory_space<vmem>>, vector<16x384xbf16>
    tpu.vector_store %arg16[%c80_83, %c0_84], %91 {strides = array<i32>} : memref<144x384xbf16, #tpu.memory_space<vmem>>, vector<16x384xbf16>,
    %c0_85 = arith.constant 0 : index
    %c145_86 = arith.constant 145 : index
    %93 = vector.load %arg15[%c0_85, %c145_86] : memref<16x640xbf16, #tpu.memory_space<vmem>>, vector<16x384xbf16>
    %c96_87 = arith.constant 96 : index
    %c0_88 = arith.constant 0 : index
    %94 = vector.load %arg16[%c96_87, %c0_88] : memref<144x384xbf16, #tpu.memory_space<vmem>>, vector<16x384xbf16>
    tpu.vector_store %arg16[%c96_87, %c0_88], %93 {strides = array<i32>} : memref<144x384xbf16, #tpu.memory_space<vmem>>, vector<16x384xbf16>,
    %c0_89 = arith.constant 0 : index
    %c146_90 = arith.constant 146 : index
    %95 = vector.load %arg15[%c0_89, %c146_90] : memref<16x640xbf16, #tpu.memory_space<vmem>>, vector<16x384xbf16>
    %c112_91 = arith.constant 112 : index
    %c0_92 = arith.constant 0 : index
    %96 = vector.load %arg16[%c112_91, %c0_92] : memref<144x384xbf16, #tpu.memory_space<vmem>>, vector<16x384xbf16>
    tpu.vector_store %arg16[%c112_91, %c0_92], %95 {strides = array<i32>} : memref<144x384xbf16, #tpu.memory_space<vmem>>, vector<16x384xbf16>,
    %c0_93 = arith.constant 0 : index
    %c147_94 = arith.constant 147 : index
    %97 = vector.load %arg15[%c0_93, %c147_94] : memref<16x640xbf16, #tpu.memory_space<vmem>>, vector<16x384xbf16>
    %c128_95 = arith.constant 128 : index
    %c0_96 = arith.constant 0 : index
    %98 = vector.load %arg16[%c128_95, %c0_96] : memref<144x384xbf16, #tpu.memory_space<vmem>>, vector<16x384xbf16>
    tpu.vector_store %arg16[%c128_95, %c0_96], %97 {strides = array<i32>} : memref<144x384xbf16, #tpu.memory_space<vmem>>, vector<16x384xbf16>,
    %c0_97 = arith.constant 0 : index
    %c0_98 = arith.constant 0 : index
    %99 = vector.load %arg5[%c0_97, %c0_98] : memref<8x144xbf16, #tpu.memory_space<vmem>>, vector<8x144xbf16>
    %c0_99 = arith.constant 0 : index
    %c0_100 = arith.constant 0 : index
    %100 = vector.load %arg16[%c0_99, %c0_100] : memref<144x384xbf16, #tpu.memory_space<vmem>>, vector<144x384xbf16>
    %cst_101 = arith.constant dense<0.000000e+00> : vector<8x384xf32>
    %101 = tpu.matmul %99, %100, %cst_101 {dimension_numbers = #tpu.dot_dimension_numbers<[1], [0], [0], [1], [0, 0, 1, 1], [], []>} : vector<8x144xbf16>, vector<144x384xbf16>, vector<8x384xf32> -> vector<8x384xf32>
    %c0_102 = arith.constant 0 : index
    %c0_103 = arith.constant 0 : index
    %102 = vector.load %arg6[%c0_102, %c0_103] : memref<8x1xf32, #tpu.memory_space<vmem>>, vector<8x1xf32>
    %103 = vector.broadcast %102 : vector<8x1xf32> to vector<8x384xf32>
    %104 = arith.mulf %101, %103 : vector<8x384xf32>
    %c0_104 = arith.constant 0 : index
    %c0_105 = arith.constant 0 : index
    %105 = vector.load %arg7[%c0_104, %c0_105] : memref<8x1xf32, #tpu.memory_space<vmem>>, vector<8x1xf32>
    %106 = vector.broadcast %105 : vector<8x1xf32> to vector<8x384xf32>
    %107 = arith.addf %104, %106 : vector<8x384xf32>
    %108 = arith.negf %107 : vector<8x384xf32>
    %109 = math.exp %108 : vector<8x384xf32>
    %cst_106 = arith.constant 1.000000e+00 : f32
    %110 = vector.broadcast %cst_106 : f32 to vector<8x384xf32>
    %111 = arith.addf %110, %109 : vector<8x384xf32>
    %112 = arith.divf %110, %111 : vector<8x384xf32>
    %113 = arith.mulf %107, %112 : vector<8x384xf32>
    %c0_107 = arith.constant 0 : index
    %c0_108 = arith.constant 0 : index
    %114 = vector.load %arg9[%c0_107, %c0_108] : memref<384x25xf32, #tpu.memory_space<vmem>>, vector<384x25xf32>
    %cst_109 = arith.constant dense<0.000000e+00> : vector<8x25xf32>
    %115 = tpu.matmul %113, %114, %cst_109 {dimension_numbers = #tpu.dot_dimension_numbers<[1], [0], [0], [1], [0, 0, 1, 1], [], []>} : vector<8x384xf32>, vector<384x25xf32>, vector<8x25xf32> -> vector<8x25xf32>
    %cst_110 = arith.constant dense<0.000000e+00> : vector<8xf32>
    %116 = vector.multi_reduction <add>, %115, %cst_110 [1] : vector<8x25xf32> to vector<8xf32>
    %117 = vector.shape_cast %116 : vector<8xf32> to vector<8x1xf32>
    %cst_111 = arith.constant 2.500000e+01 : f32
    %118 = vector.broadcast %cst_111 : f32 to vector<8x1xf32>
    %119 = arith.divf %117, %118 : vector<8x1xf32>
    %120 = vector.extract_strided_slice %115 {offsets = [0, 1], sizes = [8, 24], strides = [1, 1]} : vector<8x25xf32> to vector<8x24xf32>
    %cst_112 = arith.constant 0.000000e+00 : f32
    %121 = vector.broadcast %cst_112 : f32 to vector<8x1xf32>
    %122 = tpu.concatenate %120, %121 in 1 : vector<8x24xf32>, vector<8x1xf32> -> vector<8x25xf32>
    %cst_113 = arith.constant 0.000000e+00 : f32
    %123 = vector.broadcast %cst_113 : f32 to vector<8x1xf32>
    %124 = vector.extract_strided_slice %115 {offsets = [0, 0], sizes = [8, 24], strides = [1, 1]} : vector<8x25xf32> to vector<8x24xf32>
    %125 = tpu.concatenate %123, %124 in 1 : vector<8x1xf32>, vector<8x24xf32> -> vector<8x25xf32>
    %c0_114 = arith.constant 0 : index
    %c0_115 = arith.constant 0 : index
    %c0_116 = arith.constant 0 : index
    %126 = vector.load %arg11[%c0_114, %c0_115, %c0_116] : memref<3x8x8xf32, #tpu.memory_space<vmem>>, vector<1x8x8xf32>
    %127 = vector.shape_cast %126 : vector<1x8x8xf32> to vector<8x8xf32>
    %cst_117 = arith.constant dense<0.000000e+00> : vector<8x25xf32>
    %128 = tpu.matmul %127, %115, %cst_117 {dimension_numbers = #tpu.dot_dimension_numbers<[1], [0], [0], [1], [0, 0, 1, 1], [], []>} : vector<8x8xf32>, vector<8x25xf32>, vector<8x25xf32> -> vector<8x25xf32>
    %c1 = arith.constant 1 : index
    %c0_118 = arith.constant 0 : index
    %c0_119 = arith.constant 0 : index
    %129 = vector.load %arg11[%c1, %c0_118, %c0_119] : memref<3x8x8xf32, #tpu.memory_space<vmem>>, vector<1x8x8xf32>
    %130 = vector.shape_cast %129 : vector<1x8x8xf32> to vector<8x8xf32>
    %cst_120 = arith.constant dense<0.000000e+00> : vector<8x25xf32>
    %131 = tpu.matmul %130, %122, %cst_120 {dimension_numbers = #tpu.dot_dimension_numbers<[1], [0], [0], [1], [0, 0, 1, 1], [], []>} : vector<8x8xf32>, vector<8x25xf32>, vector<8x25xf32> -> vector<8x25xf32>
    %132 = arith.addf %128, %131 : vector<8x25xf32>
    %c2 = arith.constant 2 : index
    %c0_121 = arith.constant 0 : index
    %c0_122 = arith.constant 0 : index
    %133 = vector.load %arg11[%c2, %c0_121, %c0_122] : memref<3x8x8xf32, #tpu.memory_space<vmem>>, vector<1x8x8xf32>
    %134 = vector.shape_cast %133 : vector<1x8x8xf32> to vector<8x8xf32>
    %cst_123 = arith.constant dense<0.000000e+00> : vector<8x25xf32>
    %135 = tpu.matmul %134, %125, %cst_123 {dimension_numbers = #tpu.dot_dimension_numbers<[1], [0], [0], [1], [0, 0, 1, 1], [], []>} : vector<8x8xf32>, vector<8x25xf32>, vector<8x25xf32> -> vector<8x25xf32>
    %136 = arith.addf %132, %135 : vector<8x25xf32>
    %c0_124 = arith.constant 0 : index
    %c0_125 = arith.constant 0 : index
    %137 = vector.load %arg12[%c0_124, %c0_125] : memref<8x8xf32, #tpu.memory_space<vmem>>, vector<8x8xf32>
    %138 = vector.shape_cast %119 : vector<8x1xf32> to vector<8x1xf32>
    %139 = vector.broadcast %138 : vector<8x1xf32> to vector<8x25xf32>
    %cst_126 = arith.constant dense<0.000000e+00> : vector<8x25xf32>
    %140 = tpu.matmul %137, %139, %cst_126 {dimension_numbers = #tpu.dot_dimension_numbers<[1], [0], [0], [1], [0, 0, 1, 1], [], []>} : vector<8x8xf32>, vector<8x25xf32>, vector<8x25xf32> -> vector<8x25xf32>
    %141 = arith.negf %140 : vector<8x25xf32>
    %142 = math.exp %141 : vector<8x25xf32>
    %cst_127 = arith.constant 1.000000e+00 : f32
    %143 = vector.broadcast %cst_127 : f32 to vector<8x25xf32>
    %144 = arith.addf %143, %142 : vector<8x25xf32>
    %145 = arith.divf %143, %144 : vector<8x25xf32>
    %cst_128 = arith.constant 5.000000e-01 : f32
    %146 = vector.broadcast %cst_128 : f32 to vector<8x25xf32>
    %147 = arith.mulf %145, %146 : vector<8x25xf32>
    %148 = arith.negf %136 : vector<8x25xf32>
    %149 = math.exp %148 : vector<8x25xf32>
    %cst_129 = arith.constant 1.000000e+00 : f32
    %150 = vector.broadcast %cst_129 : f32 to vector<8x25xf32>
    %151 = arith.addf %150, %149 : vector<8x25xf32>
    %152 = arith.divf %150, %151 : vector<8x25xf32>
    %cst_130 = arith.constant 5.000000e-01 : f32
    %153 = vector.broadcast %cst_130 : f32 to vector<8x25xf32>
    %154 = arith.mulf %152, %153 : vector<8x25xf32>
    %155 = arith.addf %147, %154 : vector<8x25xf32>
    %c0_131 = arith.constant 0 : index
    %c0_132 = arith.constant 0 : index
    %156 = vector.load %arg10[%c0_131, %c0_132] : memref<25x384xf32, #tpu.memory_space<vmem>>, vector<25x384xf32>
    %cst_133 = arith.constant dense<0.000000e+00> : vector<8x384xf32>
    %157 = tpu.matmul %155, %156, %cst_133 {dimension_numbers = #tpu.dot_dimension_numbers<[1], [0], [0], [1], [0, 0, 1, 1], [], []>} : vector<8x25xf32>, vector<25x384xf32>, vector<8x384xf32> -> vector<8x384xf32>
    %158 = arith.mulf %113, %157 : vector<8x384xf32>
    %159 = vector.extract_strided_slice %158 {offsets = [0, 19], sizes = [8, 16], strides = [1, 1]} : vector<8x384xf32> to vector<8x16xf32>
    %c0_134 = arith.constant 0 : index
    %c0_135 = arith.constant 0 : index
    %c0_136 = arith.constant 0 : index
    %160 = vector.load %arg1[%c0_134, %c0_135, %c0_136] : memref<1x8x256xf32, #tpu.memory_space<vmem>>, vector<1x8x16xf32>
    %161 = vector.shape_cast %160 : vector<1x8x16xf32> to vector<8x16xf32>
    %162 = arith.addf %159, %161 : vector<8x16xf32>
    %c0_137 = arith.constant 0 : index
    %c0_138 = arith.constant 0 : index
    %c0_139 = arith.constant 0 : index
    %163 = vector.load %arg13[%c0_137, %c0_138, %c0_139] : memref<1x8x256xf32, #tpu.memory_space<vmem>>, vector<1x8x16xf32>
    %164 = vector.shape_cast %163 : vector<1x8x16xf32> to vector<8x16xf32>
    %165 = vector.shape_cast %162 : vector<8x16xf32> to vector<1x8x16xf32>
    tpu.vector_store %arg13[%c0_137, %c0_138, %c0_139], %165 {strides = array<i32>} : memref<1x8x256xf32, #tpu.memory_space<vmem>>, vector<1x8x16xf32>,
    %166 = vector.extract_strided_slice %158 {offsets = [0, 37], sizes = [8, 16], strides = [1, 1]} : vector<8x384xf32> to vector<8x16xf32>
    %c0_140 = arith.constant 0 : index
    %c0_141 = arith.constant 0 : index
    %c16_142 = arith.constant 16 : index
    %167 = vector.load %arg1[%c0_140, %c0_141, %c16_142] : memref<1x8x256xf32, #tpu.memory_space<vmem>>, vector<1x8x16xf32>
    %168 = vector.shape_cast %167 : vector<1x8x16xf32> to vector<8x16xf32>
    %169 = arith.addf %166, %168 : vector<8x16xf32>
    %c0_143 = arith.constant 0 : index
    %c0_144 = arith.constant 0 : index
    %c16_145 = arith.constant 16 : index
    %170 = vector.load %arg13[%c0_143, %c0_144, %c16_145] : memref<1x8x256xf32, #tpu.memory_space<vmem>>, vector<1x8x16xf32>
    %171 = vector.shape_cast %170 : vector<1x8x16xf32> to vector<8x16xf32>
    %172 = vector.shape_cast %169 : vector<8x16xf32> to vector<1x8x16xf32>
    tpu.vector_store %arg13[%c0_143, %c0_144, %c16_145], %172 {strides = array<i32>} : memref<1x8x256xf32, #tpu.memory_space<vmem>>, vector<1x8x16xf32>,
    %173 = vector.extract_strided_slice %158 {offsets = [0, 55], sizes = [8, 16], strides = [1, 1]} : vector<8x384xf32> to vector<8x16xf32>
    %c0_146 = arith.constant 0 : index
    %c0_147 = arith.constant 0 : index
    %c32_148 = arith.constant 32 : index
    %174 = vector.load %arg1[%c0_146, %c0_147, %c32_148] : memref<1x8x256xf32, #tpu.memory_space<vmem>>, vector<1x8x16xf32>
    %175 = vector.shape_cast %174 : vector<1x8x16xf32> to vector<8x16xf32>
    %176 = arith.addf %173, %175 : vector<8x16xf32>
    %c0_149 = arith.constant 0 : index
    %c0_150 = arith.constant 0 : index
    %c32_151 = arith.constant 32 : index
    %177 = vector.load %arg13[%c0_149, %c0_150, %c32_151] : memref<1x8x256xf32, #tpu.memory_space<vmem>>, vector<1x8x16xf32>
    %178 = vector.shape_cast %177 : vector<1x8x16xf32> to vector<8x16xf32>
    %179 = vector.shape_cast %176 : vector<8x16xf32> to vector<1x8x16xf32>
    tpu.vector_store %arg13[%c0_149, %c0_150, %c32_151], %179 {strides = array<i32>} : memref<1x8x256xf32, #tpu.memory_space<vmem>>, vector<1x8x16xf32>,
    %180 = vector.extract_strided_slice %158 {offsets = [0, 73], sizes = [8, 16], strides = [1, 1]} : vector<8x384xf32> to vector<8x16xf32>
    %c0_152 = arith.constant 0 : index
    %c0_153 = arith.constant 0 : index
    %c48_154 = arith.constant 48 : index
    %181 = vector.load %arg1[%c0_152, %c0_153, %c48_154] : memref<1x8x256xf32, #tpu.memory_space<vmem>>, vector<1x8x16xf32>
    %182 = vector.shape_cast %181 : vector<1x8x16xf32> to vector<8x16xf32>
    %183 = arith.addf %180, %182 : vector<8x16xf32>
    %c0_155 = arith.constant 0 : index
    %c0_156 = arith.constant 0 : index
    %c48_157 = arith.constant 48 : index
    %184 = vector.load %arg13[%c0_155, %c0_156, %c48_157] : memref<1x8x256xf32, #tpu.memory_space<vmem>>, vector<1x8x16xf32>
    %185 = vector.shape_cast %184 : vector<1x8x16xf32> to vector<8x16xf32>
    %186 = vector.shape_cast %183 : vector<8x16xf32> to vector<1x8x16xf32>
    tpu.vector_store %arg13[%c0_155, %c0_156, %c48_157], %186 {strides = array<i32>} : memref<1x8x256xf32, #tpu.memory_space<vmem>>, vector<1x8x16xf32>,
    %187 = vector.extract_strided_slice %158 {offsets = [0, 91], sizes = [8, 16], strides = [1, 1]} : vector<8x384xf32> to vector<8x16xf32>
    %c0_158 = arith.constant 0 : index
    %c0_159 = arith.constant 0 : index
    %c64_160 = arith.constant 64 : index
    %188 = vector.load %arg1[%c0_158, %c0_159, %c64_160] : memref<1x8x256xf32, #tpu.memory_space<vmem>>, vector<1x8x16xf32>
    %189 = vector.shape_cast %188 : vector<1x8x16xf32> to vector<8x16xf32>
    %190 = arith.addf %187, %189 : vector<8x16xf32>
    %c0_161 = arith.constant 0 : index
    %c0_162 = arith.constant 0 : index
    %c64_163 = arith.constant 64 : index
    %191 = vector.load %arg13[%c0_161, %c0_162, %c64_163] : memref<1x8x256xf32, #tpu.memory_space<vmem>>, vector<1x8x16xf32>
    %192 = vector.shape_cast %191 : vector<1x8x16xf32> to vector<8x16xf32>
    %193 = vector.shape_cast %190 : vector<8x16xf32> to vector<1x8x16xf32>
    tpu.vector_store %arg13[%c0_161, %c0_162, %c64_163], %193 {strides = array<i32>} : memref<1x8x256xf32, #tpu.memory_space<vmem>>, vector<1x8x16xf32>,
    %194 = vector.extract_strided_slice %158 {offsets = [0, 109], sizes = [8, 16], strides = [1, 1]} : vector<8x384xf32> to vector<8x16xf32>
    %c0_164 = arith.constant 0 : index
    %c0_165 = arith.constant 0 : index
    %c80_166 = arith.constant 80 : index
    %195 = vector.load %arg1[%c0_164, %c0_165, %c80_166] : memref<1x8x256xf32, #tpu.memory_space<vmem>>, vector<1x8x16xf32>
    %196 = vector.shape_cast %195 : vector<1x8x16xf32> to vector<8x16xf32>
    %197 = arith.addf %194, %196 : vector<8x16xf32>
    %c0_167 = arith.constant 0 : index
    %c0_168 = arith.constant 0 : index
    %c80_169 = arith.constant 80 : index
    %198 = vector.load %arg13[%c0_167, %c0_168, %c80_169] : memref<1x8x256xf32, #tpu.memory_space<vmem>>, vector<1x8x16xf32>
    %199 = vector.shape_cast %198 : vector<1x8x16xf32> to vector<8x16xf32>
    %200 = vector.shape_cast %197 : vector<8x16xf32> to vector<1x8x16xf32>
    tpu.vector_store %arg13[%c0_167, %c0_168, %c80_169], %200 {strides = array<i32>} : memref<1x8x256xf32, #tpu.memory_space<vmem>>, vector<1x8x16xf32>,
    %201 = vector.extract_strided_slice %158 {offsets = [0, 127], sizes = [8, 16], strides = [1, 1]} : vector<8x384xf32> to vector<8x16xf32>
    %c0_170 = arith.constant 0 : index
    %c0_171 = arith.constant 0 : index
    %c96_172 = arith.constant 96 : index
    %202 = vector.load %arg1[%c0_170, %c0_171, %c96_172] : memref<1x8x256xf32, #tpu.memory_space<vmem>>, vector<1x8x16xf32>
    %203 = vector.shape_cast %202 : vector<1x8x16xf32> to vector<8x16xf32>
    %204 = arith.addf %201, %203 : vector<8x16xf32>
    %c0_173 = arith.constant 0 : index
    %c0_174 = arith.constant 0 : index
    %c96_175 = arith.constant 96 : index
    %205 = vector.load %arg13[%c0_173, %c0_174, %c96_175] : memref<1x8x256xf32, #tpu.memory_space<vmem>>, vector<1x8x16xf32>
    %206 = vector.shape_cast %205 : vector<1x8x16xf32> to vector<8x16xf32>
    %207 = vector.shape_cast %204 : vector<8x16xf32> to vector<1x8x16xf32>
    tpu.vector_store %arg13[%c0_173, %c0_174, %c96_175], %207 {strides = array<i32>} : memref<1x8x256xf32, #tpu.memory_space<vmem>>, vector<1x8x16xf32>,
    %208 = vector.extract_strided_slice %158 {offsets = [0, 145], sizes = [8, 16], strides = [1, 1]} : vector<8x384xf32> to vector<8x16xf32>
    %c0_176 = arith.constant 0 : index
    %c0_177 = arith.constant 0 : index
    %c112_178 = arith.constant 112 : index
    %209 = vector.load %arg1[%c0_176, %c0_177, %c112_178] : memref<1x8x256xf32, #tpu.memory_space<vmem>>, vector<1x8x16xf32>
    %210 = vector.shape_cast %209 : vector<1x8x16xf32> to vector<8x16xf32>
    %211 = arith.addf %208, %210 : vector<8x16xf32>
    %c0_179 = arith.constant 0 : index
    %c0_180 = arith.constant 0 : index
    %c112_181 = arith.constant 112 : index
    %212 = vector.load %arg13[%c0_179, %c0_180, %c112_181] : memref<1x8x256xf32, #tpu.memory_space<vmem>>, vector<1x8x16xf32>
    %213 = vector.shape_cast %212 : vector<1x8x16xf32> to vector<8x16xf32>
    %214 = vector.shape_cast %211 : vector<8x16xf32> to vector<1x8x16xf32>
    tpu.vector_store %arg13[%c0_179, %c0_180, %c112_181], %214 {strides = array<i32>} : memref<1x8x256xf32, #tpu.memory_space<vmem>>, vector<1x8x16xf32>,
    %215 = vector.extract_strided_slice %158 {offsets = [0, 163], sizes = [8, 16], strides = [1, 1]} : vector<8x384xf32> to vector<8x16xf32>
    %c0_182 = arith.constant 0 : index
    %c0_183 = arith.constant 0 : index
    %c128_184 = arith.constant 128 : index
    %216 = vector.load %arg1[%c0_182, %c0_183, %c128_184] : memref<1x8x256xf32, #tpu.memory_space<vmem>>, vector<1x8x16xf32>
    %217 = vector.shape_cast %216 : vector<1x8x16xf32> to vector<8x16xf32>
    %218 = arith.addf %215, %217 : vector<8x16xf32>
    %c0_185 = arith.constant 0 : index
    %c0_186 = arith.constant 0 : index
    %c128_187 = arith.constant 128 : index
    %219 = vector.load %arg13[%c0_185, %c0_186, %c128_187] : memref<1x8x256xf32, #tpu.memory_space<vmem>>, vector<1x8x16xf32>
    %220 = vector.shape_cast %219 : vector<1x8x16xf32> to vector<8x16xf32>
    %221 = vector.shape_cast %218 : vector<8x16xf32> to vector<1x8x16xf32>
    tpu.vector_store %arg13[%c0_185, %c0_186, %c128_187], %221 {strides = array<i32>} : memref<1x8x256xf32, #tpu.memory_space<vmem>>, vector<1x8x16xf32>,
    %222 = vector.extract_strided_slice %158 {offsets = [0, 181], sizes = [8, 16], strides = [1, 1]} : vector<8x384xf32> to vector<8x16xf32>
    %c0_188 = arith.constant 0 : index
    %c0_189 = arith.constant 0 : index
    %c144 = arith.constant 144 : index
    %223 = vector.load %arg1[%c0_188, %c0_189, %c144] : memref<1x8x256xf32, #tpu.memory_space<vmem>>, vector<1x8x16xf32>
    %224 = vector.shape_cast %223 : vector<1x8x16xf32> to vector<8x16xf32>
    %225 = arith.addf %222, %224 : vector<8x16xf32>
    %c0_190 = arith.constant 0 : index
    %c0_191 = arith.constant 0 : index
    %c144_192 = arith.constant 144 : index
    %226 = vector.load %arg13[%c0_190, %c0_191, %c144_192] : memref<1x8x256xf32, #tpu.memory_space<vmem>>, vector<1x8x16xf32>
    %227 = vector.shape_cast %226 : vector<1x8x16xf32> to vector<8x16xf32>
    %228 = vector.shape_cast %225 : vector<8x16xf32> to vector<1x8x16xf32>
    tpu.vector_store %arg13[%c0_190, %c0_191, %c144_192], %228 {strides = array<i32>} : memref<1x8x256xf32, #tpu.memory_space<vmem>>, vector<1x8x16xf32>,
    %229 = vector.extract_strided_slice %158 {offsets = [0, 199], sizes = [8, 16], strides = [1, 1]} : vector<8x384xf32> to vector<8x16xf32>
    %c0_193 = arith.constant 0 : index
    %c0_194 = arith.constant 0 : index
    %c160 = arith.constant 160 : index
    %230 = vector.load %arg1[%c0_193, %c0_194, %c160] : memref<1x8x256xf32, #tpu.memory_space<vmem>>, vector<1x8x16xf32>
    %231 = vector.shape_cast %230 : vector<1x8x16xf32> to vector<8x16xf32>
    %232 = arith.addf %229, %231 : vector<8x16xf32>
    %c0_195 = arith.constant 0 : index
    %c0_196 = arith.constant 0 : index
    %c160_197 = arith.constant 160 : index
    %233 = vector.load %arg13[%c0_195, %c0_196, %c160_197] : memref<1x8x256xf32, #tpu.memory_space<vmem>>, vector<1x8x16xf32>
    %234 = vector.shape_cast %233 : vector<1x8x16xf32> to vector<8x16xf32>
    %235 = vector.shape_cast %232 : vector<8x16xf32> to vector<1x8x16xf32>
    tpu.vector_store %arg13[%c0_195, %c0_196, %c160_197], %235 {strides = array<i32>} : memref<1x8x256xf32, #tpu.memory_space<vmem>>, vector<1x8x16xf32>,
    %236 = vector.extract_strided_slice %158 {offsets = [0, 217], sizes = [8, 16], strides = [1, 1]} : vector<8x384xf32> to vector<8x16xf32>
    %c0_198 = arith.constant 0 : index
    %c0_199 = arith.constant 0 : index
    %c176 = arith.constant 176 : index
    %237 = vector.load %arg1[%c0_198, %c0_199, %c176] : memref<1x8x256xf32, #tpu.memory_space<vmem>>, vector<1x8x16xf32>
    %238 = vector.shape_cast %237 : vector<1x8x16xf32> to vector<8x16xf32>
    %239 = arith.addf %236, %238 : vector<8x16xf32>
    %c0_200 = arith.constant 0 : index
    %c0_201 = arith.constant 0 : index
    %c176_202 = arith.constant 176 : index
    %240 = vector.load %arg13[%c0_200, %c0_201, %c176_202] : memref<1x8x256xf32, #tpu.memory_space<vmem>>, vector<1x8x16xf32>
    %241 = vector.shape_cast %240 : vector<1x8x16xf32> to vector<8x16xf32>
    %242 = vector.shape_cast %239 : vector<8x16xf32> to vector<1x8x16xf32>
    tpu.vector_store %arg13[%c0_200, %c0_201, %c176_202], %242 {strides = array<i32>} : memref<1x8x256xf32, #tpu.memory_space<vmem>>, vector<1x8x16xf32>,
    %243 = vector.extract_strided_slice %158 {offsets = [0, 235], sizes = [8, 16], strides = [1, 1]} : vector<8x384xf32> to vector<8x16xf32>
    %c0_203 = arith.constant 0 : index
    %c0_204 = arith.constant 0 : index
    %c192 = arith.constant 192 : index
    %244 = vector.load %arg1[%c0_203, %c0_204, %c192] : memref<1x8x256xf32, #tpu.memory_space<vmem>>, vector<1x8x16xf32>
    %245 = vector.shape_cast %244 : vector<1x8x16xf32> to vector<8x16xf32>
    %246 = arith.addf %243, %245 : vector<8x16xf32>
    %c0_205 = arith.constant 0 : index
    %c0_206 = arith.constant 0 : index
    %c192_207 = arith.constant 192 : index
    %247 = vector.load %arg13[%c0_205, %c0_206, %c192_207] : memref<1x8x256xf32, #tpu.memory_space<vmem>>, vector<1x8x16xf32>
    %248 = vector.shape_cast %247 : vector<1x8x16xf32> to vector<8x16xf32>
    %249 = vector.shape_cast %246 : vector<8x16xf32> to vector<1x8x16xf32>
    tpu.vector_store %arg13[%c0_205, %c0_206, %c192_207], %249 {strides = array<i32>} : memref<1x8x256xf32, #tpu.memory_space<vmem>>, vector<1x8x16xf32>,
    %250 = vector.extract_strided_slice %158 {offsets = [0, 253], sizes = [8, 16], strides = [1, 1]} : vector<8x384xf32> to vector<8x16xf32>
    %c0_208 = arith.constant 0 : index
    %c0_209 = arith.constant 0 : index
    %c208 = arith.constant 208 : index
    %251 = vector.load %arg1[%c0_208, %c0_209, %c208] : memref<1x8x256xf32, #tpu.memory_space<vmem>>, vector<1x8x16xf32>
    %252 = vector.shape_cast %251 : vector<1x8x16xf32> to vector<8x16xf32>
    %253 = arith.addf %250, %252 : vector<8x16xf32>
    %c0_210 = arith.constant 0 : index
    %c0_211 = arith.constant 0 : index
    %c208_212 = arith.constant 208 : index
    %254 = vector.load %arg13[%c0_210, %c0_211, %c208_212] : memref<1x8x256xf32, #tpu.memory_space<vmem>>, vector<1x8x16xf32>
    %255 = vector.shape_cast %254 : vector<1x8x16xf32> to vector<8x16xf32>
    %256 = vector.shape_cast %253 : vector<8x16xf32> to vector<1x8x16xf32>
    tpu.vector_store %arg13[%c0_210, %c0_211, %c208_212], %256 {strides = array<i32>} : memref<1x8x256xf32, #tpu.memory_space<vmem>>, vector<1x8x16xf32>,
    %257 = vector.extract_strided_slice %158 {offsets = [0, 271], sizes = [8, 16], strides = [1, 1]} : vector<8x384xf32> to vector<8x16xf32>
    %c0_213 = arith.constant 0 : index
    %c0_214 = arith.constant 0 : index
    %c224 = arith.constant 224 : index
    %258 = vector.load %arg1[%c0_213, %c0_214, %c224] : memref<1x8x256xf32, #tpu.memory_space<vmem>>, vector<1x8x16xf32>
    %259 = vector.shape_cast %258 : vector<1x8x16xf32> to vector<8x16xf32>
    %260 = arith.addf %257, %259 : vector<8x16xf32>
    %c0_215 = arith.constant 0 : index
    %c0_216 = arith.constant 0 : index
    %c224_217 = arith.constant 224 : index
    %261 = vector.load %arg13[%c0_215, %c0_216, %c224_217] : memref<1x8x256xf32, #tpu.memory_space<vmem>>, vector<1x8x16xf32>
    %262 = vector.shape_cast %261 : vector<1x8x16xf32> to vector<8x16xf32>
    %263 = vector.shape_cast %260 : vector<8x16xf32> to vector<1x8x16xf32>
    tpu.vector_store %arg13[%c0_215, %c0_216, %c224_217], %263 {strides = array<i32>} : memref<1x8x256xf32, #tpu.memory_space<vmem>>, vector<1x8x16xf32>,
    %264 = vector.extract_strided_slice %158 {offsets = [0, 289], sizes = [8, 16], strides = [1, 1]} : vector<8x384xf32> to vector<8x16xf32>
    %c0_218 = arith.constant 0 : index
    %c0_219 = arith.constant 0 : index
    %c240 = arith.constant 240 : index
    %265 = vector.load %arg1[%c0_218, %c0_219, %c240] : memref<1x8x256xf32, #tpu.memory_space<vmem>>, vector<1x8x16xf32>
    %266 = vector.shape_cast %265 : vector<1x8x16xf32> to vector<8x16xf32>
    %267 = arith.addf %264, %266 : vector<8x16xf32>
    %c0_220 = arith.constant 0 : index
    %c0_221 = arith.constant 0 : index
    %c240_222 = arith.constant 240 : index
    %268 = vector.load %arg13[%c0_220, %c0_221, %c240_222] : memref<1x8x256xf32, #tpu.memory_space<vmem>>, vector<1x8x16xf32>
    %269 = vector.shape_cast %268 : vector<1x8x16xf32> to vector<8x16xf32>
    %270 = vector.shape_cast %267 : vector<8x16xf32> to vector<1x8x16xf32>
    tpu.vector_store %arg13[%c0_220, %c0_221, %c240_222], %270 {strides = array<i32>} : memref<1x8x256xf32, #tpu.memory_space<vmem>>, vector<1x8x16xf32>,
    return
  }
  func.func @transform_0(%arg0: i32) -> (i32, i32, i32) {
    %c0_i32 = arith.constant 0 : i32
    %c0_i32_0 = arith.constant 0 : i32
    %c0_i32_1 = arith.constant 0 : i32
    return %arg0, %c0_i32, %c0_i32_0 : i32, i32, i32
  }
  func.func @transform_1(%arg0: i32) -> (i32, i32) {
    %c0_i32 = arith.constant 0 : i32
    %c0_i32_0 = arith.constant 0 : i32
    %c0_i32_1 = arith.constant 0 : i32
    return %c0_i32, %c0_i32_0 : i32, i32
  }
  func.func @transform_2(%arg0: i32) -> (i32, i32) {
    %c0_i32 = arith.constant 0 : i32
    %c0_i32_0 = arith.constant 0 : i32
    %c0_i32_1 = arith.constant 0 : i32
    return %c0_i32, %c0_i32_0 : i32, i32
  }
  func.func @transform_3(%arg0: i32) -> (i32, i32) {
    %c0_i32 = arith.constant 0 : i32
    %c0_i32_0 = arith.constant 0 : i32
    %c0_i32_1 = arith.constant 0 : i32
    return %c0_i32, %c0_i32_0 : i32, i32
  }
  func.func @transform_4(%arg0: i32) -> (i32, i32) {
    %c0_i32 = arith.constant 0 : i32
    %c0_i32_0 = arith.constant 0 : i32
    %c0_i32_1 = arith.constant 0 : i32
    return %c0_i32, %c0_i32_0 : i32, i32
  }
  func.func @transform_5(%arg0: i32) -> (i32, i32) {
    %c0_i32 = arith.constant 0 : i32
    %c0_i32_0 = arith.constant 0 : i32
    %c0_i32_1 = arith.constant 0 : i32
    return %c0_i32, %c0_i32_0 : i32, i32
  }
  func.func @transform_6(%arg0: i32) -> (i32, i32) {
    %c0_i32 = arith.constant 0 : i32
    %c0_i32_0 = arith.constant 0 : i32
    %c0_i32_1 = arith.constant 0 : i32
    return %c0_i32, %c0_i32_0 : i32, i32
  }
  func.func @transform_7(%arg0: i32) -> (i32, i32) {
    %c0_i32 = arith.constant 0 : i32
    %c0_i32_0 = arith.constant 0 : i32
    %c0_i32_1 = arith.constant 0 : i32
    return %c0_i32, %c0_i32_0 : i32, i32
  }
  func.func @transform_8(%arg0: i32) -> (i32, i32) {
    %c0_i32 = arith.constant 0 : i32
    %c0_i32_0 = arith.constant 0 : i32
    %c0_i32_1 = arith.constant 0 : i32
    return %c0_i32, %c0_i32_0 : i32, i32
  }
  func.func @transform_9(%arg0: i32) -> (i32, i32) {
    %c0_i32 = arith.constant 0 : i32
    %c0_i32_0 = arith.constant 0 : i32
    %c0_i32_1 = arith.constant 0 : i32
    return %c0_i32, %c0_i32_0 : i32, i32
  }
  func.func @transform_10(%arg0: i32) -> (i32, i32, i32) {
    %c0_i32 = arith.constant 0 : i32
    %c0_i32_0 = arith.constant 0 : i32
    %c0_i32_1 = arith.constant 0 : i32
    %c0_i32_2 = arith.constant 0 : i32
    return %c0_i32, %c0_i32_0, %c0_i32_1 : i32, i32, i32
  }
  func.func @transform_11(%arg0: i32) -> (i32, i32) {
    %c0_i32 = arith.constant 0 : i32
    %c0_i32_0 = arith.constant 0 : i32
    %c0_i32_1 = arith.constant 0 : i32
    return %c0_i32, %c0_i32_0 : i32, i32
  }
  func.func @transform_12(%arg0: i32) -> (i32, i32, i32) {
    %c0_i32 = arith.constant 0 : i32
    %c0_i32_0 = arith.constant 0 : i32
    %c0_i32_1 = arith.constant 0 : i32
    return %arg0, %c0_i32, %c0_i32_0 : i32, i32, i32
  }
}

</mosaic_0001>

<bundles_post_ra>
// kernel: _lambda_.1
= control target key start
LH: loop header
LB: loop body
LE: loop exit
PB: predicated region body
PF: predicated region fallthrough
CT: control target
= control target key end

     0   :  { %17 = vsyncpa [#allocation6], 0  ;;  %s3379_s21 = smov 0   ;;  %s3959_s0 = inlined_call_operand.vmem [shape: f32[2,8,256], index: 0, kind: input, shape index: {}]   ;;  %s3960_s1 = inlined_call_operand.vmem [shape: bf16[16,144], index: 1, kind: input, shape index: {}]   ;;  %s3961_s2 = inlined_call_operand.vmem [shape: f32[16,1], index: 2, kind: input, shape index: {}]   ;;  %s3962_s3 = inlined_call_operand.vmem [shape: f32[16,1], index: 3, kind: input, shape index: {}]   ;;  %s3963_s4 = inlined_call_operand.vmem [shape: bf16[8,144], index: 4, kind: input, shape index: {}]   ;;  %s3964_s5 = inlined_call_operand.vmem [shape: f32[8,1], index: 5, kind: input, shape index: {}]   ;;  %s3965_s6 = inlined_call_operand.vmem [shape: f32[8,1], index: 6, kind: input, shape index: {}]   ;;  %s3966_s7 = inlined_call_operand.vmem [shape: f32[1,384], index: 7, kind: input, shape index: {}]   ;;  %s3967_s8 = inlined_call_operand.hbm [shape: f32[384,25], index: 8, kind: input, shape index: {}]   ;;  %s3968_s9 = inlined_call_operand.vmem [shape: f32[25,384], index: 9, kind: input, shape index: {}]   ;;  %s3969_s10 = inlined_call_operand.vmem [shape: f32[3,8,8], index: 10, kind: input, shape index: {}]   ;;  %s3970_s11 = inlined_call_operand.vmem [shape: f32[8,8], index: 11, kind: input, shape index: {}]   ;;  %s3971_s12 = inlined_call_operand.vmem [shape: f32[2,8,256], index: 12, kind: output, shape index: {}]  }
   0x1 LB: > { %s3385_s22 = sadd.s32 4294967295, %s3268_s21   ;;  %p2854_p0 = scmp.ge.s32.totalorder %s3268_s21, 1  ;;  %s3268_s21 = sphi %s3379_s21, %s23_s21  }
   0x2   : > { %p311_p1 = scmp.lt.s32.totalorder %s3268_s21, 3  ;;  %s3270_s23 = smov [#allocation5]  }
   0x3   : > { %s344_s24 = sshll.u32 %s3270_s23, 4  ;;  %p3105_p3 = scmp.eq.s32.totalorder %s3385_s22, 0  ;;  %s345_s24 = int_to_ptr.vmem [resolvable:$true] %s344_s24 }
   0x4   : > { %p3389_p2 = pnand %p2854_p0, %p311_p1  ;;  %s3243_s26 = scalar_lea.vmem %s345_s24, 6144 }
   0x5   : > { %p3244_p7 = scmp.ne.s32.totalorder %s345_s24, %s3243_s26  ;;  %p3251_p10 = scmp.lt.s32.totalorder %s345_s24, %s345_s24 }
   0x6   : > { %p3101_p4 = pneg %p3389_p2  ;;  %p3252_p11 = scmp.lt.s32.totalorder %s3243_s26, %s3243_s26 }
   0x8   : > { %p3102_p5 = pnand %p3105_p3, %p3101_p4  ;;  %p3253_p12 = por %p3252_p11, %p3251_p10 }
   0xa   : > { %p3234_p6 = pneg %p3102_p5 }
   0xc   : > { %p3246_p8 = pnand %p3244_p7, %p3234_p6 }
   0xe   : > { %p3247_p9 = pneg %p3246_p8 }
  0x10   : > { %p3254_p13 = pnand %p3253_p12, %p3247_p9 }
  0x12   : > { %3257 = shalt.err (!%p3254_p13)
}
  0x13   : > { %s3271_s27 = smov 128   ;;  %s3272_s28 = smov 8  }
  0x14   : > { %3104 = dma.hbm_to_vmem [thread:$0]  (!%p3102_p5), %s3967_s8, 6144, %s345_s24, [#allocation6], %s3271_s27, %s3271_s27, %s3272_s28  }
  0x15   : > { %377 = sbr.rel (%p3389_p2) target bundleno = 1990 (0x7c6), region = 68 }
  0x1a   : > { %3263 = dma.done.wait (%p3105_p3), [#allocation6], 6144  }
  0x1b   : > { %3265 = vsyncadd (%p3105_p3), [#allocation6], 4294961152  ;;  %p419_p0 = scmp.lt.s32.totalorder %s3385_s22, 1  ;;  %v3273_v0 = vmov 0   ;;  %vm440_vm0 = vcmask 1043456   ;;  %s3984_s17 = smov 21  }
  0x1c   : > { %430 = vst [vmem:[#allocation2] sm:$0xff] %v3273_v0  ;;  %431 = vst [vmem:[#allocation2 + $0x8] sm:$0xff] %v3273_v0  ;;  %1146 = vmatprep.subr.bf16.mxu1 %v3273_v0  ;;  %3160 = vset.pattern.permute.xlu1 %v3273_v0  ;;  %s3988_s18 = smov 19   ;;  %s3981_s19 = smov 23   ;;  %vm457_vm1 = vcmask 281752   ;;  %vm466_vm2 = vcmask 429352  }
  0x1d   : > { %432 = vst [vmem:[#allocation2 + $0x10] sm:$0xf] %v3273_v0  ;;  %433 = vst [vmem:[#allocation2 + $0x14] sm:$0xff] %v3273_v0  ;;  %s4009_s22 = smov (!%p419_p0, %s3385_s22), 1  ;;  %3159 = vset.pattern.permute.xlu0 %v3273_v0  ;;  %s3979_s20 = smov 25   ;;  %vm475_vm3 = vcmask 576952  }
  0x1e   : > { %434 = vst [vmem:[#allocation2 + $0x1c] sm:$0xff] %v3273_v0  ;;  %435 = vst [vmem:[#allocation2 + $0x24] sm:$0xf] %v3273_v0  ;;  %s3972_s13 = sshll.u32 %s4009_s22, 4  ;;  %s3985_s23 = smov 31   ;;  %vm484_vm4 = vcmask 724552  }
  0x1f   : > { %614 = vst [vmem:[#allocation3] sm:$0xf] %v3273_v0  ;;  %615 = vst [vmem:[#allocation3 + $0x14] sm:$0xf] %v3273_v0  ;;  %s3432_s16 = scalar_lea.vmem %s3959_s0, %s3972_s13  ;;  %s3978_s24 = smov 27   ;;  %vm493_vm5 = vcmask 872152  }
  0x20   : > { %616 = vst [vmem:[#allocation3 + $0x10] sm:$0xf] %v3273_v0  ;;  %617 = vst [vmem:[#allocation3 + $0x24] sm:$0xf] %v3273_v0  ;;  %v436_v1 = vld [vmem:[%s3432_s16] sm:$0xff]  ;;  %v437_v6 = vld [vmem:[%s3432_s16 + $0x8] sm:$0xff] }
  0x21   : > { %v438_v2 = vpack.c.bf16 %v436_v1, %v436_v1  ;;  %v439_v7 = vpack.c.bf16 %v437_v6, %v437_v6  ;;  %s3973_s25 = smov 29   ;;  %s3983_s26 = smov 33   ;;  %vm516_vm6 = vcmask 1044472   ;;  %vm517_vm7 = vcmask 121860   ;;  %v3174_v63 = vld [vmem:[%s3960_s1 + $0x4] ss:$8 sps:$4 sm:$0xff]  }
  0x22   : > { %s3986_s27 = smov 35   ;;  %s3982_s28 = smov 37   ;;  %vm511_vm8 = vcmask 252928   ;;  %vm502_vm9 = vcmask 1019752   ;;  %vm518_vm10 = vmor %vm517_vm7, %vm516_vm6  ;;  %vm527_vm11 = vcmask 265352   ;;  %vm541_vm12 = vcmask 412952  }
  0x23   : > { %v443_v3 = vsel %vm440_vm0, %v438_v2, 0  ;;  %v445_v8 = vsel %vm440_vm0, %v439_v7, 0  ;;  %s3980_s29 = smov 39   ;;  %s3976_s30 = smov 45   ;;  %vm550_vm13 = vcmask 560552   ;;  %vm559_vm14 = vcmask 708152  }
  0x24   : > { %v2863_v4 = vcombine.low %v443_v3, %v443_v3  ;;  %v2864_v5 = vcombine.high %v443_v3, %v443_v3  ;;  %v2866_v9 = vcombine.high %v445_v8, %v445_v8  ;;  %v2865_v10 = vcombine.low %v445_v8, %v445_v8  ;;  %s3987_s14 = smov 41   ;;  %s3977_s15 = smov 43   ;;  %v1188_v1 = vld [vmem:[%s3961_s2 + $0x8] sm:$0xff]  ;;  %v1187_v2 = vld [vmem:[%s3961_s2] sm:$0xff] }
  0x25   : > { %s3975_s13 = smov 47   ;;  %vm568_vm15 = vcmask 855752   ;;  %vm602_vm6 = vcmask 248952   ;;  %vm611_vm7 = vcmask 396552   ;;  %v1206_v3 = vld [vmem:[%s3962_s3 + $0x8] sm:$0xff] }
  0x26   : > { %460 = vrot.lane.b32.xlu1 %v2863_v4, %s3984_s17  ;;  %451 = vrot.lane.b32.xlu0 %v2863_v4, %s3988_s18 }
  0x2a   : > { %462 = vrot.lane.b32.xlu1 %v2864_v5, %s3984_s17  ;;  %453 = vrot.lane.b32.xlu0 %v2864_v5, %s3988_s18  ;;  %s4000_s17 = smov 25  }
  0x2e   : > { %471 = vrot.lane.b32.xlu1 %v2864_v5, %s3981_s19  ;;  %469 = vrot.lane.b32.xlu0 %v2863_v4, %s3981_s19  ;;  %s3996_s19 = smov 33  }
  0x32   : > { %480 = vrot.lane.b32.xlu1 %v2864_v5, %s3979_s20  ;;  %478 = vrot.lane.b32.xlu0 %v2863_v4, %s3979_s20  ;;  %s3295_s20 = smov 18  }
  0x36   : > { %507 = vrot.lane.b32.xlu1 %v2864_v5, %s3985_s23  ;;  %505 = vrot.lane.b32.xlu0 %v2863_v4, %s3985_s23  ;;  %s4004_s23 = smov 29  }
  0x3a   : > { %489 = vrot.lane.b32.xlu1 %v2864_v5, %s3978_s24  ;;  %487 = vrot.lane.b32.xlu0 %v2863_v4, %s3978_s24  ;;  %s3294_s24 = smov 127  }
  0x3e   : > { %498 = vrot.lane.b32.xlu1 %v2864_v5, %s3973_s25  ;;  %496 = vrot.lane.b32.xlu0 %v2863_v4, %s3973_s25  ;;  %s3974_s25 = smov 49  }
  0x42   : > { %523 = vrot.lane.b32.xlu1 %v2864_v5, %s3983_s26  ;;  %521 = vrot.lane.b32.xlu0 %v2863_v4, %s3983_s26  ;;  %v1205_v4 = vld [vmem:[%s3962_s3] sm:$0xff]  ;;  %s4006_s26 = smov 49  }
  0x46   : > { %537 = vrot.lane.b32.xlu1 %v2866_v9, %s3986_s27  ;;  %535 = vrot.lane.b32.xlu0 %v2865_v10, %s3986_s27  ;;  %s3991_s27 = smov 19  }
  0x4a   : > { %546 = vrot.lane.b32.xlu1 %v2866_v9, %s3982_s28  ;;  %544 = vrot.lane.b32.xlu0 %v2865_v10, %s3982_s28  ;;  %s3998_s28 = smov 23  }
  0x4e   : > { %555 = vrot.lane.b32.xlu1 %v2866_v9, %s3980_s29  ;;  %553 = vrot.lane.b32.xlu0 %v2865_v10, %s3980_s29  ;;  %s3296_s29 = smov 109  }
  0x52   : > { %582 = vrot.lane.b32.xlu1 %v2866_v9, %s3976_s30  ;;  %580 = vrot.lane.b32.xlu0 %v2865_v10, %s3976_s30  ;;  %s3292_s30 = smov 110  }
  0x56   : > { %564 = vrot.lane.b32.xlu1 %v2866_v9, %s3987_s14  ;;  %562 = vrot.lane.b32.xlu0 %v2865_v10, %s3987_s14  ;;  %s3994_s14 = smov 31  }
  0x5a   : > { %573 = vrot.lane.b32.xlu1 %v2866_v9, %s3977_s15  ;;  %571 = vrot.lane.b32.xlu0 %v2865_v10, %s3977_s15  ;;  %s3293_s15 = smov 111  }
  0x5e   : > { %598 = vrot.lane.b32.xlu1 %v2866_v9, %s3975_s13  ;;  %596 = vrot.lane.b32.xlu0 %v2865_v10, %s3975_s13  ;;  %s3291_s13 = smov 17  }
  0x62   : > { %607 = vrot.lane.b32.xlu1 %v2866_v9, %s3974_s25  ;;  %605 = vrot.lane.b32.xlu0 %v2865_v10, %s3974_s25  ;;  %s3290_s25 = smov 1  }
  0x98   : > { %v461_v11 = vpop.permute.xlu1 %460  ;;  %v452_v12 = vpop.permute.xlu0 %451 }
  0x99   : > { %458 = vst.msk [vmem:[#allocation2 + $0x4] sm:$0xf] %vm457_vm1, %v452_v12 }
  0x9a   : > { %467 = vst.msk [vmem:[#allocation2 + $0x4] sm:$0xf] %vm466_vm2, %v461_v11 }
  0x9c   : > { %v463_v13 = vpop.permute.xlu1 %462  ;;  %v454_v14 = vpop.permute.xlu0 %453 }
  0x9d   : > { %459 = vst.msk [vmem:[#allocation2 + $0x18] sm:$0xf] %vm457_vm1, %v454_v14  ;;  %vm591_vm1 = vcmask 1044456  }
  0x9e   : > { %468 = vst.msk [vmem:[#allocation2 + $0x18] sm:$0xf] %vm466_vm2, %v463_v13  ;;  %vm592_vm2 = vcmask 105476  }
  0xa0   : > { %v472_v15 = vpop.permute.xlu1 %471  ;;  %v470_v16 = vpop.permute.xlu0 %469 }
  0xa1   : > { %477 = vst.msk [vmem:[#allocation2 + $0x18] sm:$0xf] %vm475_vm3, %v472_v15  ;;  %476 = vst.msk [vmem:[#allocation2 + $0x4] sm:$0xf] %vm475_vm3, %v470_v16  ;;  %vm586_vm3 = vcmask 367616  }
  0xa4   : > { %v481_v17 = vpop.permute.xlu1 %480  ;;  %v479_v18 = vpop.permute.xlu0 %478 }
  0xa5   : > { %486 = vst.msk [vmem:[#allocation2 + $0x18] sm:$0xf] %vm484_vm4, %v481_v17  ;;  %485 = vst.msk [vmem:[#allocation2 + $0x4] sm:$0xf] %vm484_vm4, %v479_v18  ;;  %vm577_vm4 = vcmask 1003352  }
  0xa8   : > { %v508_v19 = vpop.permute.xlu1 %507  ;;  %v506_v20 = vpop.permute.xlu0 %505 }
  0xa9   : > { %v510_v23 = vrot.slane %v508_v19, 4  ;;  %v509_v24 = vrot.slane %v506_v20, 4 }
  0xab   : > { %v513_v27 = vsel %vm511_vm8, %v510_v23, %v508_v19  ;;  %v512_v28 = vsel %vm511_vm8, %v509_v24, %v506_v20  ;;  %vm1099_vm8 = vcmask 130048  }
  0xac   : > { %v490_v21 = vpop.permute.xlu1 %489  ;;  %v488_v22 = vpop.permute.xlu0 %487  ;;  %2897 = vmatprep.mubr.msk.bf16.mxu1 %vm1099_vm8, %v3174_v63  ;;  %2896 = vmatprep.mubr.msk.bf16.mxu0 %vm1099_vm8, %v3174_v63 }
  0xad   : > { %495 = vst.msk [vmem:[#allocation2 + $0x18] sm:$0xf] %vm493_vm5, %v490_v21  ;;  %494 = vst.msk [vmem:[#allocation2 + $0x4] sm:$0xf] %vm493_vm5, %v488_v22 }
  0xae   : > { %vm593_vm5 = vmor %vm592_vm2, %vm591_vm1  ;;  %vm894_vm1 = vcmask 891904   ;;  %vm2089_vm2 = vcmask 203776  }
  0xb0   : > { %v499_v25 = vpop.permute.xlu1 %498  ;;  %v497_v26 = vpop.permute.xlu0 %496 }
  0xb1   : > { %504 = vst.msk [vmem:[#allocation2 + $0x18] sm:$0xf] %vm502_vm9, %v499_v25  ;;  %503 = vst.msk [vmem:[#allocation2 + $0x4] sm:$0xf] %vm502_vm9, %v497_v26  ;;  %vm859_vm9 = vcmask 900096  }
  0xb2   : > { %520 = vst.msk [vmem:[#allocation2 + $0x18] sm:$0xff] %vm518_vm10, %v513_v27  ;;  %519 = vst.msk [vmem:[#allocation2 + $0x4] sm:$0xff] %vm518_vm10, %v512_v28  ;;  %vm824_vm10 = vcmask 908288  }
  0xb4   : > { %v524_v29 = vpop.permute.xlu1 %523  ;;  %v522_v30 = vpop.permute.xlu0 %521 }
  0xb5   : > { %529 = vst.msk [vmem:[#allocation2 + $0x1c] sm:$0xf] %vm527_vm11, %v524_v29  ;;  %528 = vst.msk [vmem:[#allocation2 + $0x8] sm:$0xf] %vm527_vm11, %v522_v30  ;;  %vm789_vm11 = vcmask 1039360  }
  0xb8   : > { %v538_v31 = vpop.permute.xlu1 %537  ;;  %v536_v32 = vpop.permute.xlu0 %535 }
  0xb9   : > { %543 = vst.msk [vmem:[#allocation2 + $0x1c] sm:$0xf] %vm541_vm12, %v538_v31  ;;  %542 = vst.msk [vmem:[#allocation2 + $0x8] sm:$0xf] %vm541_vm12, %v536_v32  ;;  %v3470_v33 = vld [vmem:[#allocation2] sm:$0xff]  ;;  %v3474_v36 = vld [vmem:[#allocation2 + $0x14] sm:$0xff] }
  0xba   : > { %733 = vrot.lane.b32.xlu0 %v3470_v33, %s3290_s25  ;;  %vm746_vm12 = vcmask 7168  }
  0xbc   : > { %v547_v34 = vpop.permute.xlu1 %546  ;;  %v545_v35 = vpop.permute.xlu0 %544 }
  0xbd   : > { %552 = vst.msk [vmem:[#allocation2 + $0x1c] sm:$0xf] %vm550_vm13, %v547_v34  ;;  %551 = vst.msk [vmem:[#allocation2 + $0x8] sm:$0xf] %vm550_vm13, %v545_v35  ;;  %vm711_vm13 = vcmask 138240  }
  0xbe   : > { %737 = vrot.lane.b32.xlu0 %v3474_v36, %s3290_s25 }
  0xc0   : > { %v556_v37 = vpop.permute.xlu1 %555  ;;  %v554_v38 = vpop.permute.xlu0 %553 }
  0xc1   : > { %561 = vst.msk [vmem:[#allocation2 + $0x1c] sm:$0xf] %vm559_vm14, %v556_v37  ;;  %560 = vst.msk [vmem:[#allocation2 + $0x8] sm:$0xf] %vm559_vm14, %v554_v38  ;;  %vm676_vm14 = vcmask 146432  }
  0xc2   : > { %698 = vrot.lane.b32.xlu0 %v3470_v33, %s3291_s13 }
  0xc4   : > { %v583_v39 = vpop.permute.xlu1 %582  ;;  %v581_v40 = vpop.permute.xlu0 %580 }
  0xc5   : > { %v585_v43 = vrot.slane %v583_v39, 4  ;;  %v584_v44 = vrot.slane %v581_v40, 4 }
  0xc6   : > { %702 = vrot.lane.b32.xlu0 %v3474_v36, %s3291_s13 }
  0xc7   : > { %v588_v47 = vsel %vm586_vm3, %v585_v43, %v583_v39  ;;  %v587_v48 = vsel %vm586_vm3, %v584_v44, %v581_v40  ;;  %vm2109_vm3 = vcmask 64512  }
  0xc8   : > { %v565_v41 = vpop.permute.xlu1 %564  ;;  %v563_v42 = vpop.permute.xlu0 %562 }
  0xc9   : > { %570 = vst.msk [vmem:[#allocation2 + $0x1c] sm:$0xf] %vm568_vm15, %v565_v41  ;;  %569 = vst.msk [vmem:[#allocation2 + $0x8] sm:$0xf] %vm568_vm15, %v563_v42  ;;  %vm641_vm15 = vcmask 154624  }
  0xcc   : > { %v574_v45 = vpop.permute.xlu1 %573  ;;  %v572_v46 = vpop.permute.xlu0 %571 }
  0xcd   : > { %579 = vst.msk [vmem:[#allocation2 + $0x1c] sm:$0xf] %vm577_vm4, %v574_v45  ;;  %578 = vst.msk [vmem:[#allocation2 + $0x8] sm:$0xf] %vm577_vm4, %v572_v46  ;;  %vm2099_vm4 = vcmask 195584  }
  0xce   : > { %595 = vst.msk [vmem:[#allocation2 + $0x1c] sm:$0xff] %vm593_vm5, %v588_v47  ;;  %594 = vst.msk [vmem:[#allocation2 + $0x8] sm:$0xff] %vm593_vm5, %v587_v48 }
  0xcf   : > { %vm2947_vm5 = vmneg %vm746_vm12 }
  0xd0   : > { %v599_v49 = vpop.permute.xlu1 %598  ;;  %v597_v50 = vpop.permute.xlu0 %596 }
  0xd1   : > { %604 = vst.msk [vmem:[#allocation2 + $0x20] sm:$0xf] %vm602_vm6, %v599_v49  ;;  %603 = vst.msk [vmem:[#allocation2 + $0xc] sm:$0xf] %vm602_vm6, %v597_v50  ;;  %vm2436_vm6 = vcmask 1040384  }
  0xd4   : > { %v608_v51 = vpop.permute.xlu1 %607  ;;  %v606_v52 = vpop.permute.xlu0 %605 }
  0xd5   : > { %613 = vst.msk [vmem:[#allocation2 + $0x20] sm:$0xf] %vm611_vm7, %v608_v51  ;;  %612 = vst.msk [vmem:[#allocation2 + $0xc] sm:$0xf] %vm611_vm7, %v606_v52  ;;  %v3482_v53 = vld [vmem:[#allocation2 + $0x4] sm:$0xff]  ;;  %v3484_v54 = vld [vmem:[#allocation2 + $0x18] sm:$0xff] }
  0xd6   : > { %846 = vrot.lane.b32.xlu0 %v3482_v53, %s3292_s30  ;;  %v2882_v55 = vcombine.high %v3482_v53, %v3484_v54  ;;  %v2881_v56 = vcombine.low %v3482_v53, %v3484_v54  ;;  %vm2611_vm7 = vcmask 261248  }
  0xda   : > { %850 = vrot.lane.b32.xlu0 %v3484_v54, %s3292_s30 }
  0xdc   : > { %v763_v57 = vld [vmem:[#allocation2 + $0x20] sm:$0xf]  ;;  %v761_v58 = vld [vmem:[#allocation2 + $0xc] sm:$0xf] }
  0xdd   : > { %v839_v59 = vld [vmem:[#allocation2 + $0xc] sm:$0xff]  ;;  %767 = vst [vmem:[#allocation4 + $0x74] sm:$0xf] %v763_v57  ;;  %765 = vst [vmem:[#allocation4 + $0x68] sm:$0xf] %v761_v58  ;;  %v841_v60 = vld [vmem:[#allocation2 + $0x20] sm:$0xff] }
  0xde   : > { %848 = vrot.lane.b32.xlu1 %v839_v59, %s3292_s30  ;;  %811 = vrot.lane.b32.xlu0 %v3482_v53, %s3293_s15  ;;  %v726_v61 = vld [vmem:[#allocation2 + $0x8] sm:$0xff]  ;;  %v728_v62 = vld [vmem:[#allocation2 + $0x1c] sm:$0xff] }
  0xe2   : > { %852 = vrot.lane.b32.xlu1 %v841_v60, %s3292_s30  ;;  %815 = vrot.lane.b32.xlu0 %v3484_v54, %s3293_s15 }
  0xe6   : > { %813 = vrot.lane.b32.xlu1 %v839_v59, %s3293_s15  ;;  %776 = vrot.lane.b32.xlu0 %v3482_v53, %s3294_s24 }
  0xea   : > { %817 = vrot.lane.b32.xlu1 %v841_v60, %s3293_s15  ;;  %780 = vrot.lane.b32.xlu0 %v3484_v54, %s3294_s24 }
  0xee   : > { %778 = vrot.lane.b32.xlu1 %v839_v59, %s3294_s24  ;;  %663 = vrot.lane.b32.xlu0 %v3470_v33, %s3295_s20 }
  0xf2   : > { %782 = vrot.lane.b32.xlu1 %v841_v60, %s3294_s24  ;;  %667 = vrot.lane.b32.xlu0 %v3474_v36, %s3295_s20 }
  0xf6   : > { %735 = vrot.lane.b32.xlu1 %v726_v61, %s3290_s25  ;;  %627 = vrot.lane.b32.xlu0 %v3470_v33, %s3988_s18 }
  0xfa   : > { %739 = vrot.lane.b32.xlu1 %v728_v62, %s3290_s25  ;;  %631 = vrot.lane.b32.xlu0 %v3474_v36, %s3988_s18 }
  0xfe   : > { %700 = vrot.lane.b32.xlu1 %v726_v61, %s3291_s13  ;;  %881 = vrot.lane.b32.xlu0 %v3482_v53, %s3296_s29 }
 0x102   : > { %704 = vrot.lane.b32.xlu1 %v728_v62, %s3291_s13  ;;  %885 = vrot.lane.b32.xlu0 %v3484_v54, %s3296_s29 }
 0x106   : > { %665 = vrot.lane.b32.xlu1 %v726_v61, %s3295_s20  ;;  %1191 = vperm.xlu0 %3159, %v1187_v2  }
 0x10a   : > { %669 = vrot.lane.b32.xlu1 %v728_v62, %s3295_s20  ;;  %1214 = vperm.xlu0 %3159, %v1206_v3  }
 0x10e   : > { %629 = vrot.lane.b32.xlu1 %v726_v61, %s3988_s18 }
 0x112   : > { %633 = vrot.lane.b32.xlu1 %v728_v62, %s3988_s18  ;;  %s4003_s18 = smov 45  }
 0x116   : > { %883 = vrot.lane.b32.xlu1 %v839_v59, %s3296_s29 }
 0x11a   : > { %887 = vrot.lane.b32.xlu1 %v841_v60, %s3296_s29 }
 0x11e   : > { %1196 = vperm.xlu1 %3160, %v1188_v1  }
 0x122   : > { %1209 = vperm.xlu1 %3160, %v1205_v4  }
 0x12c   : > { %v3547_v5 = vpop.permute.xlu0 %733 }
 0x12d   : > { %v741_v2 = vrot.slane %v3547_v5, 4 }
 0x130   : > { %v3549_v6 = vpop.permute.xlu0 %737 }
 0x134   : > { %v3551_v7 = vpop.permute.xlu0 %698 }
 0x138   : > { %v3553_v8 = vpop.permute.xlu0 %702 }
 0x148   : > { %v847_v9 = vpop.permute.xlu0 %846 }
 0x149   : > { %v854_v14 = vrot.slane %v847_v9, 4 }
 0x14c   : > { %v851_v10 = vpop.permute.xlu0 %850 }
 0x14d   : > { %v856_v17 = vrot.slane %v851_v10, 4 }
 0x150   : > { %v849_v11 = vpop.permute.xlu1 %848  ;;  %v812_v13 = vpop.permute.xlu0 %811 }
 0x151   : > { %v855_v12 = vrot.slane %v849_v11, 4  ;;  %v819_v29 = vrot.slane %v812_v13, 4 }
 0x153   : > { %v861_v15 = vsel %vm859_vm9, %v849_v11, %v855_v12  ;;  %v858_v18 = vsel %vm440_vm0, %v854_v14, %v855_v12 }
 0x154   : > { %870 = vst [vmem:[#allocation4 + $0xb0] sm:$0xf] %v861_v15  ;;  %v853_v16 = vpop.permute.xlu1 %852  ;;  %v816_v20 = vpop.permute.xlu0 %815  ;;  %v860_v23 = vsel %vm859_vm9, %v847_v9, %v858_v18 }
 0x155   : > { %v857_v19 = vrot.slane %v853_v16, 4  ;;  %v821_v33 = vrot.slane %v816_v20, 4 }
 0x157   : > { %v862_v21 = vsel %vm440_vm0, %v856_v17, %v857_v19  ;;  %v864_v22 = vsel %vm859_vm9, %v853_v16, %v857_v19 }
 0x158   : > { %v863_v24 = vsel %vm859_vm9, %v851_v10, %v862_v21  ;;  %872 = vst [vmem:[#allocation4 + $0xbc] sm:$0xf] %v864_v22  ;;  %v814_v25 = vpop.permute.xlu1 %813  ;;  %v777_v31 = vpop.permute.xlu0 %776  ;;  %v743_v10 = vrot.slane %v3549_v6, 4  ;;  %v706_v22 = vrot.slane %v3551_v7, 4 }
 0x159   : > { %v820_v26 = vrot.slane %v814_v25, 4  ;;  %v2891_v27 = vcombine.high %v860_v23, %v863_v24  ;;  %v2890_v28 = vcombine.low %v860_v23, %v863_v24  ;;  %v784_v46 = vrot.slane %v777_v31, 4  ;;  %v3165_v23 = vld [vmem:[#allocation4 + $0x68] ss:$12 sps:$4 sm:$0xff]  }
 0x15a   : > { %v708_v24 = vrot.slane %v3553_v8, 4 }
 0x15b   : > { %v826_v30 = vsel %vm824_vm10, %v814_v25, %v820_v26  ;;  %1103 = vmatprep.subr.bf16.mxu0 %v2891_v27  ;;  %v823_v34 = vsel %vm440_vm0, %v819_v29, %v820_v26 }
 0x15c   : > { %835 = vst [vmem:[#allocation4 + $0x98] sm:$0xf] %v826_v30  ;;  %v818_v32 = vpop.permute.xlu1 %817  ;;  %1104 = vmatpush1.bf16.msra.mxu0 %v2890_v28  ;;  %v825_v39 = vsel %vm824_vm10, %v812_v13, %v823_v34  ;;  %v781_v45 = vpop.permute.xlu0 %780 }
 0x15d   : > { %v822_v35 = vrot.slane %v818_v32, 4  ;;  %v786_v49 = vrot.slane %v781_v45, 4 }
 0x15f   : > { %v827_v36 = vsel %vm440_vm0, %v821_v33, %v822_v35  ;;  %v829_v37 = vsel %vm824_vm10, %v818_v32, %v822_v35  ;;  %v3161_v38 = vld [vmem:[#allocation4 + $0xb0] ss:$12 sps:$4 sm:$0xff]  }
 0x160   : > { %v828_v40 = vsel %vm824_vm10, %v816_v20, %v827_v36  ;;  %837 = vst [vmem:[#allocation4 + $0xa4] sm:$0xf] %v829_v37  ;;  %v779_v41 = vpop.permute.xlu1 %778  ;;  %1147 = vmatpush1.bf16.msra.mxu1 %v3161_v38  ;;  %v3577_v4 = vpop.permute.xlu0 %663 }
 0x161   : > { %v785_v42 = vrot.slane %v779_v41, 4  ;;  %v2888_v43 = vcombine.high %v825_v39, %v828_v40  ;;  %v2887_v44 = vcombine.low %v825_v39, %v828_v40  ;;  %1148 = vmatprep.subr.bf16.mxu1 %v3273_v0  ;;  %v671_v34 = vrot.slane %v3577_v4, 4 }
 0x163   : > { %v791_v47 = vsel %vm789_vm11, %v779_v41, %v785_v42  ;;  %1105 = vmatprep.subr.bf16.mxu0 %v2888_v43  ;;  %v788_v50 = vsel %vm440_vm0, %v784_v46, %v785_v42 }
 0x164   : > { %800 = vst [vmem:[#allocation4 + $0x80] sm:$0xf] %v791_v47  ;;  %v783_v48 = vpop.permute.xlu1 %782  ;;  %1106 = vmatpush1.bf16.msra.mxu0 %v2887_v44  ;;  %v790_v59 = vsel %vm789_vm11, %v777_v31, %v788_v50  ;;  %v668_v21 = vpop.permute.xlu0 %667 }
 0x165   : > { %v787_v51 = vrot.slane %v783_v48, 4 }
 0x167   : > { %v792_v52 = vsel %vm440_vm0, %v786_v49, %v787_v51  ;;  %v794_v57 = vsel %vm789_vm11, %v783_v48, %v787_v51  ;;  %v3162_v58 = vld [vmem:[#allocation4 + $0x98] ss:$12 sps:$4 sm:$0xff]  }
 0x168   : > { %v793_v60 = vsel %vm789_vm11, %v781_v45, %v792_v52  ;;  %802 = vst [vmem:[#allocation4 + $0x8c] sm:$0xf] %v794_v57  ;;  %v736_v61 = vpop.permute.xlu1 %735  ;;  %1149 = vmatpush1.bf16.msra.mxu1 %v3162_v58  ;;  %v628_v27 = vpop.permute.xlu0 %627 }
 0x169   : > { %v742_v62 = vrot.slane %v736_v61, 4  ;;  %v2885_v63 = vcombine.high %v790_v59, %v793_v60  ;;  %v2884_v1 = vcombine.low %v790_v59, %v793_v60  ;;  %1150 = vmatprep.subr.bf16.mxu1 %v3273_v0  ;;  %v635_v48 = vrot.slane %v628_v27, 4 }
 0x16b   : > { %v748_v3 = vsel %vm746_vm12, %v736_v61, %v742_v62  ;;  %1107 = vmatprep.subr.bf16.mxu0 %v2885_v63  ;;  %v745_v11 = vsel %vm440_vm0, %v741_v2, %v742_v62 }
 0x16c   : > { %757 = vst [vmem:[#allocation4 + $0x50] sm:$0xf] %v748_v3  ;;  %v740_v9 = vpop.permute.xlu1 %739  ;;  %1108 = vmatpush1.bf16.msra.mxu0 %v2884_v1  ;;  %v747_v16 = vsel %vm746_vm12, %v3547_v5, %v745_v11  ;;  %v632_v38 = vpop.permute.xlu0 %631 }
 0x16d   : > { %v744_v12 = vrot.slane %v740_v9, 4  ;;  %1109 = vmatprep.subr.bf16.mxu0 %v2882_v55  ;;  %v637_v52 = vrot.slane %v632_v38, 4 }
 0x16f   : > { %v749_v13 = vsel %vm440_vm0, %v743_v10, %v744_v12  ;;  %v751_v14 = vsel %vm746_vm12, %v740_v9, %v744_v12  ;;  %v3163_v15 = vld [vmem:[#allocation4 + $0x80] ss:$12 sps:$4 sm:$0xff]  }
 0x170   : > { %v750_v17 = vsel %vm746_vm12, %v3549_v6, %v749_v13  ;;  %759 = vst [vmem:[#allocation4 + $0x5c] sm:$0xf] %v751_v14  ;;  %v701_v18 = vpop.permute.xlu1 %700  ;;  %1110 = vmatpush1.bf16.msra.mxu0 %v2881_v56  ;;  %1151 = vmatpush1.bf16.msra.mxu1 %v3163_v15  ;;  %v882_v50 = vpop.permute.xlu0 %881 }
 0x171   : > { %v707_v19 = vrot.slane %v701_v18, 4  ;;  %v2879_v55 = vcombine.high %v747_v16, %v750_v17  ;;  %v2878_v20 = vcombine.low %v747_v16, %v750_v17  ;;  %1152 = vmatprep.subr.bf16.mxu1 %v3273_v0  ;;  %v889_v10 = vrot.slane %v882_v50, 4 }
 0x173   : > { %v713_v5 = vsel %vm711_vm13, %v701_v18, %v707_v19  ;;  %1111 = vmatprep.subr.bf16.mxu0 %v2879_v55  ;;  %v710_v53 = vsel %vm440_vm0, %v706_v22, %v707_v19  ;;  %v3172_v22 = vld [vmem:[%s3960_s1] ss:$8 sps:$4 sm:$0xff]  }
 0x174   : > { %722 = vst [vmem:[#allocation4 + $0x38] sm:$0xf] %v713_v5  ;;  %v705_v6 = vpop.permute.xlu1 %704  ;;  %1112 = vmatpush1.bf16.msra.mxu0 %v2878_v20  ;;  %1153 = vmatpush1.bf16.msra.mxu1 %v3165_v23  ;;  %v712_v28 = vsel %vm711_vm13, %v3551_v7, %v710_v53  ;;  %v673_v7 = vrot.slane %v668_v21, 4  ;;  %v886_v9 = vpop.permute.xlu0 %885 }
 0x175   : > { %v709_v54 = vrot.slane %v705_v6, 4  ;;  %1154 = vmatprep.subr.bf16.mxu1 %v3273_v0  ;;  %v891_v13 = vrot.slane %v886_v9, 4 }
 0x177   : > { %v714_v56 = vsel %vm440_vm0, %v708_v24, %v709_v54  ;;  %v716_v25 = vsel %vm711_vm13, %v705_v6, %v709_v54  ;;  %v3167_v26 = vld [vmem:[#allocation4 + $0x50] ss:$12 sps:$4 sm:$0xff]  }
 0x178   : > { %v715_v29 = vsel %vm711_vm13, %v3553_v8, %v714_v56  ;;  %724 = vst [vmem:[#allocation4 + $0x44] sm:$0xf] %v716_v25  ;;  %v666_v30 = vpop.permute.xlu1 %665  ;;  %1155 = vmatpush1.bf16.msra.mxu1 %v3167_v26 }
 0x179   : > { %v672_v31 = vrot.slane %v666_v30, 4  ;;  %v2876_v32 = vcombine.high %v712_v28, %v715_v29  ;;  %v2875_v33 = vcombine.low %v712_v28, %v715_v29  ;;  %1156 = vmatprep.subr.bf16.mxu1 %v3273_v0 }
 0x17b   : > { %v678_v35 = vsel %vm676_vm14, %v666_v30, %v672_v31  ;;  %1113 = vmatprep.subr.bf16.mxu0 %v2876_v32  ;;  %v675_v8 = vsel %vm440_vm0, %v671_v34, %v672_v31 }
 0x17c   : > { %687 = vst [vmem:[#allocation4 + $0x20] sm:$0xf] %v678_v35  ;;  %v670_v36 = vpop.permute.xlu1 %669  ;;  %1114 = vmatpush1.bf16.msra.mxu0 %v2875_v33  ;;  %v677_v42 = vsel %vm676_vm14, %v3577_v4, %v675_v8 }
 0x17d   : > { %v674_v37 = vrot.slane %v670_v36, 4 }
 0x17f   : > { %v679_v39 = vsel %vm440_vm0, %v673_v7, %v674_v37  ;;  %v681_v40 = vsel %vm676_vm14, %v670_v36, %v674_v37  ;;  %v3168_v41 = vld [vmem:[#allocation4 + $0x38] ss:$12 sps:$4 sm:$0xff]  }
 0x180   : > { %v680_v43 = vsel %vm676_vm14, %v668_v21, %v679_v39  ;;  %689 = vst [vmem:[#allocation4 + $0x2c] sm:$0xf] %v681_v40  ;;  %v630_v44 = vpop.permute.xlu1 %629  ;;  %1157 = vmatpush1.bf16.msra.mxu1 %v3168_v41 }
 0x181   : > { %v636_v45 = vrot.slane %v630_v44, 4  ;;  %v2873_v46 = vcombine.high %v677_v42, %v680_v43  ;;  %v2872_v47 = vcombine.low %v677_v42, %v680_v43  ;;  %1158 = vmatprep.subr.bf16.mxu1 %v3273_v0  ;;  %v1192_v6 = vpop.permute.xlu0 %1191 }
 0x183   : > { %v643_v49 = vsel %vm641_vm15, %v630_v44, %v636_v45  ;;  %1115 = vmatprep.subr.bf16.mxu0 %v2873_v46  ;;  %v640_v57 = vsel %vm440_vm0, %v635_v48, %v636_v45 }
 0x184   : > { %652 = vst [vmem:[#allocation4 + $0x8] sm:$0xf] %v643_v49  ;;  %v634_v51 = vpop.permute.xlu1 %633  ;;  %1116 = vmatpush1.bf16.msra.mxu0 %v2872_v47  ;;  %v642_v62 = vsel %vm641_vm15, %v628_v27, %v640_v57  ;;  %v1266_v57 = vlaneseq }
 0x185   : > { %v638_v58 = vrot.slane %v634_v51, 4  ;;  %v1215_v27 = vpop.permute.xlu0 %1214 }
 0x187   : > { %v644_v59 = vsel %vm440_vm0, %v637_v52, %v638_v58  ;;  %v646_v60 = vsel %vm641_vm15, %v634_v51, %v638_v58  ;;  %v3169_v61 = vld [vmem:[#allocation4 + $0x20] ss:$12 sps:$4 sm:$0xff]  }
 0x188   : > { %v645_v63 = vsel %vm641_vm15, %v632_v38, %v644_v59  ;;  %654 = vst [vmem:[#allocation4 + $0x14] sm:$0xf] %v646_v60  ;;  %v884_v1 = vpop.permute.xlu1 %883  ;;  %1159 = vmatpush1.bf16.msra.mxu1 %v3169_v61 }
 0x189   : > { %v890_v2 = vrot.slane %v884_v1, 4  ;;  %v2870_v3 = vcombine.high %v642_v62, %v645_v63  ;;  %v2869_v4 = vcombine.low %v642_v62, %v645_v63  ;;  %1160 = vmatprep.subr.bf16.mxu1 %v3273_v0  ;;  %v1267_v63 = vshrl.u32 %v1266_v57, 7 }
 0x18b   : > { %v896_v11 = vsel %vm894_vm1, %v884_v1, %v890_v2  ;;  %1117 = vmatprep.subr.bf16.mxu0 %v2870_v3  ;;  %v893_v14 = vsel %vm440_vm0, %v889_v10, %v890_v2  ;;  %v1268_v2 = vsub.s32 0, %v1267_v63  ;;  %v1272_v3 = vsub.s32 1, %v1267_v63 }
 0x18c   : > { %905 = vst [vmem:[#allocation4 + $0xc8] sm:$0xf] %v896_v11  ;;  %v888_v12 = vpop.permute.xlu1 %887  ;;  %1118 = vmatpush1.bf16.msra.mxu0 %v2869_v4  ;;  %v895_v19 = vsel %vm894_vm1, %v882_v50, %v893_v14  ;;  %v618_v4 = vld [vmem:[%s3966_s7] sm:$0x7]  ;;  %v1276_v10 = vsub.s32 2, %v1267_v63 }
 0x18d   : > { %v892_v15 = vrot.slane %v888_v12, 4  ;;  %v1269_v11 = vrot.slane %v618_v4, %v1268_v2 }
 0x18f   : > { %v897_v16 = vsel %vm440_vm0, %v891_v13, %v892_v15  ;;  %v899_v17 = vsel %vm894_vm1, %v888_v12, %v892_v15  ;;  %v3170_v18 = vld [vmem:[#allocation4 + $0x8] ss:$12 sps:$4 sm:$0xff]   ;;  %v1273_v13 = vrot.slane %v618_v4, %v1272_v3 }
 0x190   : > { %v898_v55 = vsel %vm894_vm1, %v886_v9, %v897_v16  ;;  %907 = vst [vmem:[#allocation4 + $0xd4] sm:$0xf] %v899_v17  ;;  %1161 = vmatpush1.bf16.msra.mxu1 %v3170_v18  ;;  %v1277_v17 = vrot.slane %v618_v4, %v1276_v10 }
 0x191   : > { %v2894_v20 = vcombine.high %v895_v19, %v898_v55  ;;  %v2893_v21 = vcombine.low %v895_v19, %v898_v55  ;;  %1176 = vmatprep.subr.bf16.mxu1 %v3273_v0 }
 0x193   : > { %1133 = vmatprep.subr.bf16.mxu0 %v2894_v20 }
 0x194   : > { %1134 = vmatpush2.bf16.msra.mxu0 %v2893_v21 }
 0x197   : > { %v3171_v5 = vld [vmem:[#allocation4 + $0xc8] ss:$12 sps:$4 sm:$0xff]   ;;  %1136 = vmatmul.mubr.bf16.vlgmr.msra.gmra.mxu0 %v3172_v22 }
 0x198   : > { %1177 = vmatpush2.bf16.msra.mxu1 %v3171_v5 }
 0x199   : > { %1822 = vmatprep.subr.bf16.mxu1 %v3273_v0  ;;  %v1197_v23 = vpop.permute.xlu1 %1196 }
 0x19b   : > { %1179 = vmatmul.mubr.bf16.vlgmr.msra.gmra.mxu1 %v3172_v22 }
 0x19d   : > { %v1210_v53 = vpop.permute.xlu1 %1209 }
 0x257   : > { %v1137_v24 = vpop.f32.mrf.mxu0 }
 0x258   : > { %v1199_v54 = vmul.f32 %v1192_v6, %v1137_v24 }
 0x259   : > { %v1139_v56 = vpop.f32.mrf.mxu0 }
 0x25a   : > { %v1217_v25 = vadd.f32 %v1210_v53, %v1199_v54  ;;  %v1200_v26 = vmul.f32 %v1192_v6, %v1139_v56 }
 0x25b   : > { %v1141_v28 = vpop.f32.mrf.mxu0  ;;  %v1180_v29 = vpop.f32.mrf.mxu1 }
 0x25c   : > { %v2898_v30 = vmul.f32 -1.442695, %v1217_v25  ;;  %v1218_v31 = vadd.f32 %v1210_v53, %v1200_v26  ;;  %v1202_v32 = vmul.f32 %v1197_v23, %v1141_v28  ;;  %v1201_v33 = vmul.f32 %v1192_v6, %v1180_v29 }
 0x25d   : > { %v1143_v34 = vpop.f32.mrf.mxu0  ;;  %v1182_v35 = vpop.f32.mrf.mxu1 }
 0x25e   : > { %3186 = vpow2.f32 %v2898_v30  ;;  %v2899_v36 = vmul.f32 -1.442695, %v1218_v31  ;;  %v1220_v7 = vadd.f32 %v1215_v27, %v1202_v32  ;;  %v1203_v8 = vmul.f32 %v1197_v23, %v1143_v34 }
 0x25f   : > { %v1219_v37 = vadd.f32 %v1210_v53, %v1201_v33  ;;  %v1183_v38 = vpop.f32.mrf.mxu1 }
 0x260   : > { %3188 = vpow2.f32 %v2899_v36  ;;  %v2901_v39 = vmul.f32 -1.442695, %v1220_v7  ;;  %v1221_v40 = vadd.f32 %v1215_v27, %v1203_v8  ;;  %v1204_v42 = vmul.f32 %v1197_v23, %v1183_v38  ;;  %v3688_v38 = vld [vmem:[%s3963_s4] sm:$0xff] }
 0x261   : > { %v2900_v41 = vmul.f32 -1.442695, %v1219_v37  ;;  %v1185_v43 = vpop.f32.mrf.mxu1 }
 0x262   : > { %3190 = vpow2.f32 %v2901_v39  ;;  %v2902_v44 = vmul.f32 -1.442695, %v1221_v40  ;;  %v1222_v45 = vadd.f32 %v1215_v27, %v1204_v42  ;;  %v2909_v39 = vcombine.high %v3688_v38, %v3688_v38 }
 0x263   : > { %3192 = vpow2.f32 %v2900_v41 }
 0x264   : > { %3194 = vpow2.f32 %v2902_v44  ;;  %v2903_v46 = vmul.f32 -1.442695, %v1222_v45  ;;  %2938 = vmatprep.mubr.msk.bf16.mxu1 %vm1099_vm8, %v2909_v39  ;;  %2937 = vmatprep.mubr.msk.bf16.mxu0 %vm1099_vm8, %v2909_v39 }
 0x266   : > { %3196 = vpow2.f32 %v2903_v46 }
 0x26b   : > { %v3187_v47 = vpop.eup %3186 }
 0x26c   : > { %v1241_v48 = vadd.f32 1.0, %v3187_v47 }
 0x26d   : > { %v3189_v49 = vpop.eup %3188 }
 0x26e   : > { %3198 = vrcp.f32 %v1241_v48  ;;  %v1242_v50 = vadd.f32 1.0, %v3189_v49 }
 0x26f   : > { %v3191_v51 = vpop.eup %3190 }
 0x270   : > { %v3193_v52 = vpop.eup %3192  ;;  %3200 = vrcp.f32 %v1242_v50  ;;  %v1244_v58 = vadd.f32 1.0, %v3191_v51 }
 0x271   : > { %v3195_v59 = vpop.eup %3194  ;;  %v1243_v60 = vadd.f32 1.0, %v3193_v52 }
 0x272   : > { %3202 = vrcp.f32 %v1244_v58  ;;  %v1245_v61 = vadd.f32 1.0, %v3195_v59 }
 0x273   : > { %3204 = vrcp.f32 %v1243_v60  ;;  %v3197_v62 = vpop.eup %3196 }
 0x274   : > { %3206 = vrcp.f32 %v1245_v61  ;;  %v1246_v1 = vadd.f32 1.0, %v3197_v62 }
 0x276   : > { %3208 = vrcp.f32 %v1246_v1 }
 0x27b   : > { %v3199_v9 = vpop.eup %3198 }
 0x27c   : > { %v1259_v12 = vmul.f32 %v3199_v9, %v1217_v25 }
 0x27d   : > { %v3201_v14 = vpop.eup %3200 }
 0x27e   : > { %v1260_v15 = vmul.f32 %v3201_v14, %v1218_v31  ;;  %v3636_v19 = vmul.f32 %v1269_v11, %v1259_v12 }
 0x27f   : > { %v3203_v16 = vpop.eup %3202 }
 0x280   : > { %v3205_v18 = vpop.eup %3204  ;;  %v3638_v55 = vmul.f32 %v1273_v13, %v1260_v15  ;;  %v1262_v20 = vmul.f32 %v3203_v16, %v1220_v7 }
 0x281   : > { %v3207_v21 = vpop.eup %3206  ;;  %v1261_v22 = vmul.f32 %v3205_v18, %v1219_v37  ;;  %v1862_v37 = vld [vmem:[%s3964_s5] sm:$0xff] }
 0x282   : > { %v2962_v5 = vpack.c.bf16 %v3638_v55, %v3636_v19  ;;  %v1263_v23 = vmul.f32 %v3207_v21, %v1221_v40  ;;  %v3642_v53 = vmul.f32 %v1269_v11, %v1262_v20  ;;  %v1871_v40 = vld [vmem:[%s3965_s6] sm:$0xff] }
 0x283   : > { %v1283_v6 = vmul.f32 %v1277_v17, %v1261_v22  ;;  %v3209_v24 = vpop.eup %3208 }
 0x284   : > { %1307 = vst [vmem:[#allocation3 + $0x4] sm:$0xff] %v2962_v5  ;;  %v3644_v54 = vmul.f32 %v1273_v13, %v1263_v23  ;;  %1531 = vrot.lane.b32.xlu1 %v2962_v5, %s3292_s30  ;;  %v1264_v25 = vmul.f32 %v3209_v24, %v1222_v45  ;;  %v3230_v28 = vpack.c.bf16 %v3642_v53, %v3636_v19 }
 0x285   : > { %v2963_v56 = vpack.c.bf16 %v1283_v6, %v1283_v6 }
 0x286   : > { %v2964_v26 = vpack.c.bf16 %v3644_v54, %v3642_v53  ;;  %v1286_v27 = vmul.f32 %v1277_v17, %v1264_v25  ;;  %v3231_v29 = vpack.c.bf16 %v3644_v54, %v3638_v55 }
 0x287   : > { %1308 = vst [vmem:[#allocation3 + $0xc] sm:$0xf] %v2963_v56 }
 0x288   : > { %1309 = vst [vmem:[#allocation3 + $0x18] sm:$0xff] %v2964_v26  ;;  %1497 = vrot.lane.b32.xlu1 %v2962_v5, %s3293_s15  ;;  %v2965_v30 = vpack.c.bf16 %v1286_v27, %v1286_v27 }
 0x28a   : > { %1310 = vst [vmem:[#allocation3 + $0x20] sm:$0xf] %v2965_v30 }
 0x28b   : > { %v1413_v33 = vld [vmem:[#allocation3] sm:$0xff] }
 0x28c   : > { %1463 = vrot.lane.b32.xlu1 %v2962_v5, %s3294_s24 }
 0x28e   : > { %v1448_v31 = vld [vmem:[#allocation3 + $0xc] sm:$0xf] }
 0x28f   : > { %v1524_v32 = vld [vmem:[#allocation3 + $0xc] sm:$0xff]  ;;  %1452 = vst [vmem:[#allocation4 + $0x68] sm:$0xf] %v1448_v31  ;;  %v1415_v7 = vld [vmem:[#allocation3 + $0x14] sm:$0xff] }
 0x290   : > { %1533 = vrot.lane.b32.xlu0 %v1524_v32, %s3292_s30  ;;  %1421 = vrot.lane.b32.xlu1 %v1413_v33, %s3290_s25  ;;  %v1414_v36 = vld [vmem:[#allocation3 + $0x8] sm:$0xff] }
 0x291   : > { %v1450_v34 = vld [vmem:[#allocation3 + $0x20] sm:$0xf] }
 0x292   : > { %1454 = vst [vmem:[#allocation4 + $0x74] sm:$0xf] %v1450_v34  ;;  %v1526_v35 = vld [vmem:[#allocation3 + $0x20] sm:$0xff] }
 0x293   : > { %v1416_v8 = vld [vmem:[#allocation3 + $0x1c] sm:$0xff] }
 0x294   : > { %1499 = vrot.lane.b32.xlu0 %v1524_v32, %s3293_s15  ;;  %1387 = vrot.lane.b32.xlu1 %v1413_v33, %s3291_s13 }
 0x298   : > { %1465 = vrot.lane.b32.xlu0 %v1524_v32, %s3294_s24  ;;  %1353 = vrot.lane.b32.xlu1 %v1413_v33, %s3295_s20 }
 0x29c   : > { %1537 = vrot.lane.b32.xlu0 %v1526_v35, %s3292_s30  ;;  %1319 = vrot.lane.b32.xlu1 %v1413_v33, %s3991_s27 }
 0x2a0   : > { %1503 = vrot.lane.b32.xlu0 %v1526_v35, %s3293_s15  ;;  %1535 = vrot.lane.b32.xlu1 %v2964_v26, %s3292_s30  ;;  %s3993_s30 = smov 35  }
 0x2a4   : > { %1469 = vrot.lane.b32.xlu0 %v1526_v35, %s3294_s24  ;;  %1501 = vrot.lane.b32.xlu1 %v2964_v26, %s3293_s15  ;;  %s3995_s15 = smov 21  }
 0x2a8   : > { %1423 = vrot.lane.b32.xlu0 %v1414_v36, %s3290_s25  ;;  %1467 = vrot.lane.b32.xlu1 %v2964_v26, %s3294_s24 }
 0x2ac   : > { %1389 = vrot.lane.b32.xlu0 %v1414_v36, %s3291_s13  ;;  %1565 = vrot.lane.b32.xlu1 %v2962_v5, %s3296_s29 }
 0x2b0   : > { %1355 = vrot.lane.b32.xlu0 %v1414_v36, %s3295_s20  ;;  %1425 = vrot.lane.b32.xlu1 %v1415_v7, %s3290_s25 }
 0x2b4   : > { %1321 = vrot.lane.b32.xlu0 %v1414_v36, %s3991_s27  ;;  %1391 = vrot.lane.b32.xlu1 %v1415_v7, %s3291_s13 }
 0x2b8   : > { %1567 = vrot.lane.b32.xlu0 %v1524_v32, %s3296_s29  ;;  %1357 = vrot.lane.b32.xlu1 %v1415_v7, %s3295_s20 }
 0x2bc   : > { %1427 = vrot.lane.b32.xlu0 %v1416_v8, %s3290_s25  ;;  %1323 = vrot.lane.b32.xlu1 %v1415_v7, %s3991_s27 }
 0x2c0   : > { %1393 = vrot.lane.b32.xlu0 %v1416_v8, %s3291_s13  ;;  %1569 = vrot.lane.b32.xlu1 %v2964_v26, %s3296_s29  ;;  %s3997_s13 = smov 37  }
 0x2c4   : > { %1359 = vrot.lane.b32.xlu0 %v1416_v8, %s3295_s20  ;;  %1865 = vperm.xlu1 %3160, %v1862_v37   ;;  %s3999_s20 = smov 39  }
 0x2c8   : > { %1325 = vrot.lane.b32.xlu0 %v1416_v8, %s3991_s27 }
 0x2cc   : > { %1571 = vrot.lane.b32.xlu0 %v1526_v35, %s3296_s29 }
 0x2d0   : > { %1874 = vperm.xlu0 %3159, %v1871_v40  }
 0x2f6   : > { %v1532_v41 = vpop.permute.xlu1 %1531 }
 0x2f7   : > { %v1539_v46 = vrot.slane %v1532_v41, 4 }
 0x2fa   : > { %v1498_v42 = vpop.permute.xlu1 %1497 }
 0x2fb   : > { %v1505_v57 = vrot.slane %v1498_v42, 4 }
 0x2fe   : > { %v1464_v43 = vpop.permute.xlu1 %1463 }
 0x2ff   : > { %v1471_v1 = vrot.slane %v1464_v43, 4 }
 0x302   : > { %v1534_v44 = vpop.permute.xlu0 %1533  ;;  %v1422_v47 = vpop.permute.xlu1 %1421 }
 0x303   : > { %v1540_v45 = vrot.slane %v1534_v44, 4  ;;  %v1429_v31 = vrot.slane %v1422_v47, 4 }
 0x305   : > { %v1545_v48 = vsel %vm859_vm9, %v1534_v44, %v1540_v45  ;;  %v1543_v49 = vsel %vm440_vm0, %v1539_v46, %v1540_v45 }
 0x306   : > { %1554 = vst [vmem:[#allocation4 + $0xb0] sm:$0xf] %v1545_v48  ;;  %v1500_v50 = vpop.permute.xlu0 %1499  ;;  %v1544_v51 = vsel %vm859_vm9, %v1532_v41, %v1543_v49  ;;  %v3702_v58 = vpop.permute.xlu1 %1387 }
 0x307   : > { %v1506_v52 = vrot.slane %v1500_v50, 4 }
 0x309   : > { %v1511_v59 = vsel %vm824_vm10, %v1500_v50, %v1506_v52  ;;  %v1509_v60 = vsel %vm440_vm0, %v1505_v57, %v1506_v52 }
 0x30a   : > { %1520 = vst [vmem:[#allocation4 + $0x98] sm:$0xf] %v1511_v59  ;;  %v1466_v61 = vpop.permute.xlu0 %1465  ;;  %v1510_v62 = vsel %vm824_vm10, %v1498_v42, %v1509_v60  ;;  %v3707_v2 = vpop.permute.xlu1 %1353 }
 0x30b   : > { %v1472_v63 = vrot.slane %v1466_v61, 4  ;;  %v1361_v59 = vrot.slane %v3707_v2, 4 }
 0x30d   : > { %v1477_v3 = vsel %vm789_vm11, %v1466_v61, %v1472_v63  ;;  %v1475_v4 = vsel %vm440_vm0, %v1471_v1, %v1472_v63  ;;  %v3178_v63 = vld [vmem:[#allocation4 + $0x68] ss:$12 sps:$4 sm:$0xff]  }
 0x30e   : > { %1486 = vst [vmem:[#allocation4 + $0x80] sm:$0xf] %v1477_v3  ;;  %v1538_v9 = vpop.permute.xlu0 %1537  ;;  %v1476_v10 = vsel %vm789_vm11, %v1464_v43, %v1475_v4  ;;  %v3712_v12 = vpop.permute.xlu1 %1319  ;;  %v1395_v43 = vrot.slane %v3702_v58, 4 }
 0x30f   : > { %v1542_v11 = vrot.slane %v1538_v9, 4  ;;  %v1327_v4 = vrot.slane %v3712_v12, 4 }
 0x311   : > { %v1548_v13 = vsel %vm859_vm9, %v1538_v9, %v1542_v11 }
 0x312   : > { %1556 = vst [vmem:[#allocation4 + $0xbc] sm:$0xf] %v1548_v13  ;;  %v1504_v14 = vpop.permute.xlu0 %1503  ;;  %v1536_v16 = vpop.permute.xlu1 %1535 }
 0x313   : > { %v1508_v15 = vrot.slane %v1504_v14, 4  ;;  %v1541_v17 = vrot.slane %v1536_v16, 4 }
 0x315   : > { %v1514_v18 = vsel %vm824_vm10, %v1504_v14, %v1508_v15  ;;  %v1546_v21 = vsel %vm440_vm0, %v1541_v17, %v1542_v11 }
 0x316   : > { %1522 = vst [vmem:[#allocation4 + $0xa4] sm:$0xf] %v1514_v18  ;;  %v1470_v20 = vpop.permute.xlu0 %1469  ;;  %v1547_v5 = vsel %vm859_vm9, %v1536_v16, %v1546_v21  ;;  %v1502_v23 = vpop.permute.xlu1 %1501  ;;  %vm2623_vm9 = vcmask 392448  }
 0x317   : > { %v1474_v22 = vrot.slane %v1470_v20, 4  ;;  %v1507_v6 = vrot.slane %v1502_v23, 4  ;;  %v2931_v24 = vcombine.low %v1544_v51, %v1547_v5  ;;  %v2932_v56 = vcombine.high %v1544_v51, %v1547_v5 }
 0x319   : > { %v1480_v25 = vsel %vm789_vm11, %v1470_v20, %v1474_v22  ;;  %v3175_v26 = vld [vmem:[#allocation4 + $0xb0] ss:$12 sps:$4 sm:$0xff]   ;;  %v1512_v30 = vsel %vm440_vm0, %v1507_v6, %v1508_v15  ;;  %1781 = vmatprep.subr.bf16.mxu0 %v2932_v56 }
 0x31a   : > { %1488 = vst [vmem:[#allocation4 + $0x8c] sm:$0xf] %v1480_v25  ;;  %v1424_v27 = vpop.permute.xlu0 %1423  ;;  %1823 = vmatpush1.bf16.msra.mxu1 %v3175_v26  ;;  %v1513_v33 = vsel %vm824_vm10, %v1502_v23, %v1512_v30  ;;  %v1468_v34 = vpop.permute.xlu1 %1467  ;;  %1782 = vmatpush1.bf16.msra.mxu0 %v2931_v24  ;;  %vm2635_vm10 = vcmask 523648  }
 0x31b   : > { %v1430_v32 = vrot.slane %v1424_v27, 4  ;;  %1824 = vmatprep.subr.bf16.mxu1 %v3273_v0  ;;  %v1473_v35 = vrot.slane %v1468_v34, 4  ;;  %v2928_v36 = vcombine.low %v1510_v62, %v1513_v33  ;;  %v2929_v7 = vcombine.high %v1510_v62, %v1513_v33 }
 0x31d   : > { %v1433_v8 = vsel %vm440_vm0, %v1429_v31, %v1430_v32  ;;  %v1435_v37 = vsel %vm746_vm12, %v1424_v27, %v1430_v32  ;;  %v3176_v39 = vld [vmem:[#allocation4 + $0x98] ss:$12 sps:$4 sm:$0xff]   ;;  %v1478_v42 = vsel %vm440_vm0, %v1473_v35, %v1474_v22  ;;  %1783 = vmatprep.subr.bf16.mxu0 %v2929_v7 }
 0x31e   : > { %v3725_v40 = vsel %vm746_vm12, %v1422_v47, %v1433_v8  ;;  %1444 = vst [vmem:[#allocation4 + $0x50] sm:$0xf] %v1435_v37  ;;  %v1390_v41 = vpop.permute.xlu0 %1389  ;;  %1825 = vmatpush1.bf16.msra.mxu1 %v3176_v39  ;;  %v1479_v45 = vsel %vm789_vm11, %v1468_v34, %v1478_v42  ;;  %v1566_v46 = vpop.permute.xlu1 %1565  ;;  %1784 = vmatpush1.bf16.msra.mxu0 %v2928_v36  ;;  %vm2647_vm11 = vcmask 654848  }
 0x31f   : > { %v1396_v44 = vrot.slane %v1390_v41, 4  ;;  %1826 = vmatprep.subr.bf16.mxu1 %v3273_v0  ;;  %v2925_v48 = vcombine.low %v1476_v10, %v1479_v45  ;;  %v2926_v49 = vcombine.high %v1476_v10, %v1479_v45  ;;  %v1573_v13 = vrot.slane %v1566_v46, 4 }
 0x321   : > { %v1399_v47 = vsel %vm440_vm0, %v1395_v43, %v1396_v44  ;;  %v1401_v50 = vsel %vm711_vm13, %v1390_v41, %v1396_v44  ;;  %v3177_v51 = vld [vmem:[#allocation4 + $0x80] ss:$12 sps:$4 sm:$0xff]   ;;  %1785 = vmatprep.subr.bf16.mxu0 %v2926_v49 }
 0x322   : > { %v3735_v52 = vsel %vm711_vm13, %v3702_v58, %v1399_v47  ;;  %1410 = vst [vmem:[#allocation4 + $0x38] sm:$0xf] %v1401_v50  ;;  %v1356_v57 = vpop.permute.xlu0 %1355  ;;  %1827 = vmatpush1.bf16.msra.mxu1 %v3177_v51  ;;  %1786 = vmatpush1.bf16.msra.mxu0 %v2925_v48  ;;  %v1426_v61 = vpop.permute.xlu1 %1425 }
 0x323   : > { %v1362_v60 = vrot.slane %v1356_v57, 4  ;;  %1828 = vmatprep.subr.bf16.mxu1 %v3273_v0  ;;  %1787 = vmatprep.subr.bf16.mxu0 %v3231_v29  ;;  %v1431_v16 = vrot.slane %v1426_v61, 4 }
 0x325   : > { %v1365_v62 = vsel %vm440_vm0, %v1361_v59, %v1362_v60  ;;  %v1367_v58 = vsel %vm676_vm14, %v1356_v57, %v1362_v60 }
 0x326   : > { %v3746_v1 = vsel %vm676_vm14, %v3707_v2, %v1365_v62  ;;  %1376 = vst [vmem:[#allocation4 + $0x20] sm:$0xf] %v1367_v58  ;;  %v1322_v3 = vpop.permute.xlu0 %1321  ;;  %1829 = vmatpush1.bf16.msra.mxu1 %v3178_v63  ;;  %1788 = vmatpush1.bf16.msra.mxu0 %v3230_v28  ;;  %v1392_v10 = vpop.permute.xlu1 %1391  ;;  %v2908_v63 = vcombine.low %v3688_v38, %v3688_v38  ;;  %v1915_v38 = vld [vmem:[#allocation5 + $0x70] sm:$0xff] }
 0x327   : > { %v1328_v9 = vrot.slane %v1322_v3, 4  ;;  %1830 = vmatprep.subr.bf16.mxu1 %v3273_v0  ;;  %v1397_v5 = vrot.slane %v1392_v10, 4 }
 0x329   : > { %v1331_v55 = vsel %vm440_vm0, %v1327_v4, %v1328_v9  ;;  %v1333_v54 = vsel %vm641_vm15, %v1322_v3, %v1328_v9  ;;  %v1932_v3 = vld [vmem:[#allocation5 + $0xf8] sm:$0xff]  ;;  %v1931_v9 = vld [vmem:[#allocation5 + $0xf0] sm:$0xff] }
 0x32a   : > { %v3757_v29 = vsel %vm641_vm15, %v3712_v12, %v1331_v55  ;;  %1342 = vst [vmem:[#allocation4 + $0x8] sm:$0xf] %v1333_v54  ;;  %v1568_v2 = vpop.permute.xlu0 %1567  ;;  %v1358_v17 = vpop.permute.xlu1 %1357  ;;  %v1916_v4 = vld [vmem:[#allocation5 + $0x78] sm:$0xff]  ;;  %v3297_v55 = vmov 0.0  }
 0x32b   : > { %v1574_v11 = vrot.slane %v1568_v2, 4  ;;  %v1363_v31 = vrot.slane %v1358_v17, 4  ;;  %v1948_v54 = vld [vmem:[#allocation5 + $0x178] sm:$0xff] }
 0x32d   : > { %v1579_v14 = vsel %vm894_vm1, %v1568_v2, %v1574_v11  ;;  %v1577_v19 = vsel %vm440_vm0, %v1573_v13, %v1574_v11  ;;  %v1914_v2 = vld [vmem:[#allocation5 + $0x68] sm:$0xff]  ;;  %v1913_v13 = vld [vmem:[#allocation5 + $0x60] sm:$0xff] }
 0x32e   : > { %1588 = vst [vmem:[#allocation4 + $0xc8] sm:$0xf] %v1579_v14  ;;  %v1428_v53 = vpop.permute.xlu0 %1427  ;;  %v3762_v28 = vsel %vm894_vm1, %v1566_v46, %v1577_v19  ;;  %v1324_v27 = vpop.permute.xlu1 %1323  ;;  %v1946_v11 = vld [vmem:[#allocation5 + $0x168] sm:$0xff]  ;;  %v1928_v14 = vld [vmem:[#allocation5 + $0xd8] sm:$0xff]  ;;  %v1945_v19 = vld [vmem:[#allocation5 + $0x160] sm:$0xff] }
 0x32f   : > { %v1432_v15 = vrot.slane %v1428_v53, 4  ;;  %v1329_v39 = vrot.slane %v1324_v27, 4 }
 0x331   : > { %v1438_v12 = vsel %vm746_vm12, %v1428_v53, %v1432_v15  ;;  %v1436_v18 = vsel %vm440_vm0, %v1431_v16, %v1432_v15  ;;  %v1912_v53 = vld [vmem:[#allocation5 + $0x58] sm:$0xff]  ;;  %v1911_v16 = vld [vmem:[#allocation5 + $0x50] sm:$0xff] }
 0x332   : > { %1446 = vst [vmem:[#allocation4 + $0x5c] sm:$0xf] %v1438_v12  ;;  %v1394_v20 = vpop.permute.xlu0 %1393  ;;  %v1437_v21 = vsel %vm746_vm12, %v1426_v61, %v1436_v18  ;;  %v1570_v42 = vpop.permute.xlu1 %1569  ;;  %v1944_v15 = vld [vmem:[#allocation5 + $0x158] sm:$0xff]  ;;  %v1943_v12 = vld [vmem:[#allocation5 + $0x150] sm:$0xff]  ;;  %v1910_v18 = vld [vmem:[#allocation5 + $0x48] sm:$0xff]  ;;  %vm2659_vm12 = vcmask 786048  }
 0x333   : > { %v1398_v22 = vrot.slane %v1394_v20, 4  ;;  %v2919_v23 = vcombine.low %v3725_v40, %v1437_v21  ;;  %v2920_v6 = vcombine.high %v3725_v40, %v1437_v21  ;;  %v1575_v47 = vrot.slane %v1570_v42, 4  ;;  %v1942_v21 = vld [vmem:[#allocation5 + $0x148] sm:$0xff] }
 0x335   : > { %v1404_v24 = vsel %vm711_vm13, %v1394_v20, %v1398_v22  ;;  %v1402_v56 = vsel %vm440_vm0, %v1397_v5, %v1398_v22  ;;  %1789 = vmatprep.subr.bf16.mxu0 %v2920_v6  ;;  %v1925_v20 = vld [vmem:[#allocation5 + $0xc0] sm:$0xff]  ;;  %v1924_v5 = vld [vmem:[#allocation5 + $0xb8] sm:$0xff] }
 0x336   : > { %1412 = vst [vmem:[#allocation4 + $0x44] sm:$0xf] %v1404_v24  ;;  %v1360_v25 = vpop.permute.xlu0 %1359  ;;  %v1403_v26 = vsel %vm711_vm13, %v1392_v10, %v1402_v56  ;;  %1790 = vmatpush1.bf16.msra.mxu0 %v2919_v23  ;;  %v1929_v10 = vld [vmem:[#allocation5 + $0xe0] sm:$0xff]  ;;  %v1908_v6 = vld [vmem:[#allocation5 + $0x38] sm:$0xff]  ;;  %v1923_v24 = vld [vmem:[#allocation5 + $0xb0] sm:$0xff]  ;;  %vm2674_vm13 = vcmask 793600  }
 0x337   : > { %v1364_v30 = vrot.slane %v1360_v25, 4  ;;  %v2916_v32 = vcombine.low %v3735_v52, %v1403_v26  ;;  %v2917_v33 = vcombine.high %v3735_v52, %v1403_v26  ;;  %v1909_v22 = vld [vmem:[#allocation5 + $0x40] sm:$0xff]  ;;  %v1940_v56 = vld [vmem:[#allocation5 + $0x138] sm:$0xff]  ;;  %v1922_v26 = vld [vmem:[#allocation5 + $0xa8] sm:$0xff] }
 0x338   : > { %v1941_v23 = vld [vmem:[#allocation5 + $0x140] sm:$0xff] }
 0x339   : > { %v1370_v34 = vsel %vm676_vm14, %v1360_v25, %v1364_v30  ;;  %v1368_v35 = vsel %vm440_vm0, %v1363_v31, %v1364_v30  ;;  %v3179_v36 = vld [vmem:[#allocation4 + $0x50] ss:$12 sps:$4 sm:$0xff]   ;;  %1791 = vmatprep.subr.bf16.mxu0 %v2917_v33  ;;  %v1907_v25 = vld [vmem:[#allocation5 + $0x30] sm:$0xff]  ;;  %v1906_v30 = vld [vmem:[#allocation5 + $0x28] sm:$0xff] }
 0x33a   : > { %1378 = vst [vmem:[#allocation4 + $0x2c] sm:$0xf] %v1370_v34  ;;  %v1326_v7 = vpop.permute.xlu0 %1325  ;;  %v1369_v8 = vsel %vm676_vm14, %v1358_v17, %v1368_v35  ;;  %1792 = vmatpush1.bf16.msra.mxu0 %v2916_v32  ;;  %1831 = vmatpush1.bf16.msra.mxu1 %v3179_v36  ;;  %v1926_v17 = vld [vmem:[#allocation5 + $0xc8] sm:$0xff]  ;;  %v1921_v31 = vld [vmem:[#allocation5 + $0xa0] sm:$0xff]  ;;  %v1920_v34 = vld [vmem:[#allocation5 + $0x98] sm:$0xff]  ;;  %vm2677_vm14 = vcmask 917248  }
 0x33b   : > { %v1330_v37 = vrot.slane %v1326_v7, 4  ;;  %v2913_v40 = vcombine.low %v3746_v1, %v1369_v8  ;;  %v2914_v41 = vcombine.high %v3746_v1, %v1369_v8  ;;  %1832 = vmatprep.subr.bf16.mxu1 %v3273_v0  ;;  %v1938_v32 = vld [vmem:[#allocation5 + $0x128] sm:$0xff]  ;;  %v1905_v33 = vld [vmem:[#allocation5 + $0x20] sm:$0xff]  ;;  %v1904_v36 = vld [vmem:[#allocation5 + $0x18] sm:$0xff] }
 0x33c   : > { %v1937_v35 = vld [vmem:[#allocation5 + $0x120] sm:$0xff]  ;;  %v1936_v8 = vld [vmem:[#allocation5 + $0x118] sm:$0xff] }
 0x33d   : > { %v1336_v43 = vsel %vm641_vm15, %v1326_v7, %v1330_v37  ;;  %v1334_v44 = vsel %vm440_vm0, %v1329_v39, %v1330_v37  ;;  %v3180_v45 = vld [vmem:[#allocation4 + $0x38] ss:$12 sps:$4 sm:$0xff]   ;;  %1793 = vmatprep.subr.bf16.mxu0 %v2914_v41  ;;  %v1919_v7 = vld [vmem:[#allocation5 + $0x90] sm:$0xff] }
 0x33e   : > { %1344 = vst [vmem:[#allocation4 + $0x14] sm:$0xf] %v1336_v43  ;;  %v1572_v46 = vpop.permute.xlu0 %1571  ;;  %v1335_v48 = vsel %vm641_vm15, %v1324_v27, %v1334_v44  ;;  %1794 = vmatpush1.bf16.msra.mxu0 %v2913_v40  ;;  %1833 = vmatpush1.bf16.msra.mxu1 %v3180_v45  ;;  %v1939_v27 = vld [vmem:[#allocation5 + $0x130] sm:$0xff]  ;;  %v1918_v39 = vld [vmem:[#allocation5 + $0x88] sm:$0xff]  ;;  %v1901_v44 = vld [vmem:[#allocation5] sm:$0xff]  ;;  %vm2689_vm15 = vcmask 1048448  }
 0x33f   : > { %v1576_v49 = vrot.slane %v1572_v46, 4  ;;  %v2910_v50 = vcombine.low %v3757_v29, %v1335_v48  ;;  %v2911_v51 = vcombine.high %v3757_v29, %v1335_v48  ;;  %1834 = vmatprep.subr.bf16.mxu1 %v3273_v0  ;;  %v1930_v29 = vld [vmem:[#allocation5 + $0xe8] sm:$0xff]  ;;  %v1903_v37 = vld [vmem:[#allocation5 + $0x10] sm:$0xff]  ;;  %v1933_v45 = vld [vmem:[#allocation5 + $0x100] sm:$0xff] }
 0x340   : > { %v1935_v40 = vld [vmem:[#allocation5 + $0x110] sm:$0xff]  ;;  %v1902_v41 = vld [vmem:[#allocation5 + $0x8] sm:$0xff] }
 0x341   : > { %v1582_v52 = vsel %vm894_vm1, %v1572_v46, %v1576_v49  ;;  %v1580_v57 = vsel %vm440_vm0, %v1575_v47, %v1576_v49  ;;  %v3181_v59 = vld [vmem:[#allocation4 + $0x20] ss:$12 sps:$4 sm:$0xff]   ;;  %1795 = vmatprep.subr.bf16.mxu0 %v2911_v51  ;;  %vm3298_vm0 = vmmov 0   ;;  %v1866_v46 = vpop.permute.xlu1 %1865 }
 0x342   : > { %1590 = vst [vmem:[#allocation4 + $0xd4] sm:$0xf] %v1582_v52  ;;  %v1581_v60 = vsel %vm894_vm1, %v1570_v42, %v1580_v57  ;;  %1796 = vmatpush1.bf16.msra.mxu0 %v2910_v50  ;;  %1835 = vmatpush1.bf16.msra.mxu1 %v3181_v59  ;;  %v1917_v42 = vld [vmem:[#allocation5 + $0x80] sm:$0xff]  ;;  %v1934_v43 = vld [vmem:[#allocation5 + $0x108] sm:$0xff] }
 0x343   : > { %v2934_v61 = vcombine.low %v3762_v28, %v1581_v60  ;;  %v2935_v62 = vcombine.high %v3762_v28, %v1581_v60  ;;  %1836 = vmatprep.subr.bf16.mxu1 %v3273_v0  ;;  %v1927_v28 = vld [vmem:[#allocation5 + $0xd0] sm:$0xff] }
 0x345   : > { %v3182_v58 = vld [vmem:[#allocation4 + $0x8] ss:$12 sps:$4 sm:$0xff]   ;;  %1811 = vmatprep.subr.bf16.mxu0 %v2935_v62 }
 0x346   : > { %1812 = vmatpush2.bf16.msra.mxu0 %v2934_v61  ;;  %1837 = vmatpush1.bf16.msra.mxu1 %v3182_v58 }
 0x347   : > { %1852 = vmatprep.subr.bf16.mxu1 %v3273_v0  ;;  %2966 = vmatprep.subr.mxu0 %v1932_v3  ;;  %v1947_v0 = vld [vmem:[#allocation5 + $0x170] sm:$0xff] }
 0x349   : > { %v3183_v1 = vld [vmem:[#allocation4 + $0xc8] ss:$12 sps:$4 sm:$0xff]   ;;  %1814 = vmatmul.mubr.bf16.vlgmr.msra.gmra.mxu0 %v2908_v63 }
 0x34a   : > { %1853 = vmatpush2.bf16.msra.mxu1 %v3183_v1  ;;  %2967 = vmatpush3.msra.mxu0 %v1916_v4 }
 0x34b   : > { %3031 = vmatprep.subr.mxu1 %v3297_v55  ;;  %2968 = vmatprep.subr.mxu0 %v1931_v9  ;;  %v1875_v47 = vpop.permute.xlu0 %1874 }
 0x34c   : > { %2969 = vmatpush3.msra.mxu0 %v1915_v38 }
 0x34d   : > { %1855 = vmatmul.mubr.bf16.vlgmr.msra.gmra.mxu1 %v2908_v63  ;;  %2970 = vmatprep.subr.mxu0 %v1930_v29 }
 0x34e   : > { %3032 = vmatpush3.msra.mxu1 %v1948_v54  ;;  %2971 = vmatpush3.msra.mxu0 %v1914_v2 }
 0x34f   : > { %3033 = vmatprep.subr.mxu1 %v3297_v55  ;;  %2972 = vmatprep.subr.mxu0 %v1929_v10 }
 0x350   : > { %3034 = vmatpush3.msra.mxu1 %v1947_v0  ;;  %2973 = vmatpush3.msra.mxu0 %v1913_v13 }
 0x351   : > { %3035 = vmatprep.subr.mxu1 %v3297_v55  ;;  %2974 = vmatprep.subr.mxu0 %v1928_v14 }
 0x352   : > { %3036 = vmatpush3.msra.mxu1 %v1946_v11  ;;  %2975 = vmatpush3.msra.mxu0 %v1912_v53 }
 0x353   : > { %3037 = vmatprep.subr.mxu1 %v3297_v55  ;;  %2976 = vmatprep.subr.mxu0 %v1927_v28 }
 0x354   : > { %3038 = vmatpush3.msra.mxu1 %v1945_v19  ;;  %2977 = vmatpush3.msra.mxu0 %v1911_v16 }
 0x355   : > { %3039 = vmatprep.subr.mxu1 %v3297_v55  ;;  %2978 = vmatprep.subr.mxu0 %v1926_v17 }
 0x356   : > { %3040 = vmatpush3.msra.mxu1 %v1944_v15  ;;  %2979 = vmatpush3.msra.mxu0 %v1910_v18 }
 0x357   : > { %3041 = vmatprep.subr.mxu1 %v3297_v55  ;;  %2980 = vmatprep.subr.mxu0 %v1925_v20 }
 0x358   : > { %3042 = vmatpush3.msra.mxu1 %v1943_v12  ;;  %2981 = vmatpush3.msra.mxu0 %v1909_v22  ;;  %v2106_v22 = vld [vmem:[%s3969_s10] sm:$0xff] }
 0x359   : > { %3043 = vmatprep.subr.mxu1 %v3297_v55  ;;  %2982 = vmatprep.subr.mxu0 %v1924_v5 }
 0x35a   : > { %3044 = vmatpush3.msra.mxu1 %v1942_v21  ;;  %2983 = vmatpush3.msra.mxu0 %v1908_v6 }
 0x35b   : > { %3045 = vmatprep.subr.mxu1 %v3297_v55  ;;  %2984 = vmatprep.subr.mxu0 %v1923_v24  ;;  %v2946_v24 = vld [vmem:[%s3969_s10 + $0x10] sm:$0xff] }
 0x35c   : > { %3046 = vmatpush3.msra.mxu1 %v1941_v23  ;;  %2985 = vmatpush3.msra.mxu0 %v1907_v25  ;;  %v2942_v23 = vld [vmem:[%s3969_s10 + $0x8] sm:$0xff] }
 0x35d   : > { %3047 = vmatprep.subr.mxu1 %v3297_v55  ;;  %2986 = vmatprep.subr.mxu0 %v1922_v26 }
 0x35e   : > { %3048 = vmatpush3.msra.mxu1 %v1940_v56  ;;  %2987 = vmatpush3.msra.mxu0 %v1906_v30 }
 0x35f   : > { %3049 = vmatprep.subr.mxu1 %v3297_v55  ;;  %2988 = vmatprep.subr.mxu0 %v1921_v31 }
 0x360   : > { %3050 = vmatpush3.msra.mxu1 %v1939_v27  ;;  %2989 = vmatpush3.msra.mxu0 %v1905_v33  ;;  %v2332_v27 = vld [vmem:[%s3970_s11] sm:$0xff]  ;;  %v2430_v33 = vld [vmem:[%s3968_s9 + $0x48] sm:$0x1] }
 0x361   : > { %3051 = vmatprep.subr.mxu1 %v3297_v55  ;;  %2990 = vmatprep.subr.mxu0 %v1920_v34  ;;  %v2432_v34 = vld [vmem:[%s3968_s9 + $0x58] sm:$0x1] }
 0x362   : > { %3052 = vmatpush3.msra.mxu1 %v1938_v32  ;;  %2991 = vmatpush3.msra.mxu0 %v1904_v36  ;;  %v2431_v32 = vld [vmem:[%s3968_s9 + $0x50] sm:$0x1] }
 0x363   : > { %3053 = vmatprep.subr.mxu1 %v3297_v55  ;;  %2992 = vmatprep.subr.mxu0 %v1919_v7  ;;  %v2427_v36 = vld [vmem:[%s3968_s9 + $0x30] sm:$0xff]  ;;  %v2429_v7 = vld [vmem:[%s3968_s9 + $0x40] sm:$0xff] }
 0x364   : > { %3054 = vmatpush3.msra.mxu1 %v1937_v35  ;;  %2993 = vmatpush3.msra.mxu0 %v1903_v37  ;;  %v2428_v35 = vld [vmem:[%s3968_s9 + $0x38] sm:$0xff] }
 0x365   : > { %3055 = vmatprep.subr.mxu1 %v3297_v55  ;;  %2994 = vmatprep.subr.mxu0 %v1918_v39  ;;  %v2424_v37 = vld [vmem:[%s3968_s9 + $0x18] sm:$0xff]  ;;  %v2426_v39 = vld [vmem:[%s3968_s9 + $0x28] sm:$0xff] }
 0x366   : > { %3056 = vmatpush3.msra.mxu1 %v1936_v8  ;;  %2995 = vmatpush3.msra.mxu0 %v1902_v41  ;;  %v2425_v8 = vld [vmem:[%s3968_s9 + $0x20] sm:$0xff] }
 0x367   : > { %3057 = vmatprep.subr.mxu1 %v3297_v55  ;;  %2996 = vmatprep.subr.mxu0 %v1917_v42  ;;  %v2421_v41 = vld [vmem:[%s3968_s9] sm:$0xff]  ;;  %v2423_v42 = vld [vmem:[%s3968_s9 + $0x10] sm:$0xff] }
 0x368   : > { %3058 = vmatpush3.msra.mxu1 %v1935_v40  ;;  %2997 = vmatpush3.msra.mxu0 %v1901_v44  ;;  %v2422_v40 = vld [vmem:[%s3968_s9 + $0x8] sm:$0xff] }
 0x369   : > { %3059 = vmatprep.subr.mxu1 %v3297_v55  ;;  %3063 = vmatprep.mubr.msk.f32.mxu1 %vm3298_vm0, %v3297_v55  ;;  %v2691_v44 = vld [vmem:[%s3432_s16 + $0x8] sm:$0xff] }
 0x36a   : > { %3060 = vmatpush3.msra.mxu1 %v1934_v43  ;;  %3066 = vmatprep.subr.mxu0 %v3297_v55  ;;  %v2590_v43 = vld [vmem:[%s3432_s16] sm:$0xff]  ;;  %s4001_s16 = smov 27  }
 0x36b   : > { %3061 = vmatprep.subr.mxu1 %v3297_v55 }
 0x36c   : > { %3062 = vmatpush3.msra.mxu1 %v1933_v45 }
 0x36d   : > { %3071 = vmatprep.subr.mxu1 %v3297_v55 }
 0x409   : > { %v1815_v48 = vpop.f32.mrf.mxu0 }
 0x40a   : > { %v1868_v49 = vmul.f32 %v1866_v46, %v1815_v48 }
 0x40b   : > { %v1817_v50 = vpop.f32.mrf.mxu0 }
 0x40c   : > { %v1877_v51 = vadd.f32 %v1875_v47, %v1868_v49  ;;  %v1869_v52 = vmul.f32 %v1866_v46, %v1817_v50 }
 0x40d   : > { %v1819_v57 = vpop.f32.mrf.mxu0  ;;  %v1856_v59 = vpop.f32.mrf.mxu1 }
 0x40e   : > { %v2939_v60 = vmul.f32 -1.442695, %v1877_v51  ;;  %v1878_v61 = vadd.f32 %v1875_v47, %v1869_v52  ;;  %v1870_v62 = vmul.f32 %v1866_v46, %v1856_v59 }
 0x40f   : > { %v1820_v58 = vpop.f32.mrf.mxu0  ;;  %v1858_v1 = vpop.f32.mrf.mxu1 }
 0x410   : > { %3210 = vpow2.f32 %v2939_v60  ;;  %v2940_v63 = vmul.f32 -1.442695, %v1878_v61  ;;  %v1879_v3 = vadd.f32 %v1875_v47, %v1870_v62 }
 0x411   : > { %v1859_v4 = vpop.f32.mrf.mxu1 }
 0x412   : > { %3212 = vpow2.f32 %v2940_v63  ;;  %v2941_v9 = vmul.f32 -1.442695, %v1879_v3 }
 0x413   : > { %v1860_v54 = vpop.f32.mrf.mxu1 }
 0x414   : > { %3214 = vpow2.f32 %v2941_v9 }
 0x41d   : > { %v3211_v38 = vpop.eup %3210 }
 0x41e   : > { %v1889_v29 = vadd.f32 1.0, %v3211_v38 }
 0x41f   : > { %v3213_v0 = vpop.eup %3212 }
 0x420   : > { %v1890_v2 = vadd.f32 1.0, %v3213_v0  ;;  %3216 = vrcp.f32 %v1889_v29 }
 0x421   : > { %v3215_v10 = vpop.eup %3214 }
 0x422   : > { %3218 = vrcp.f32 %v1890_v2  ;;  %v1891_v11 = vadd.f32 1.0, %v3215_v10 }
 0x424   : > { %3220 = vrcp.f32 %v1891_v11 }
 0x42d   : > { %v3217_v13 = vpop.eup %3216 }
 0x42e   : > { %v3817_v53 = vmul.f32 %v3217_v13, %v1877_v51 }
 0x42f   : > { %v3219_v14 = vpop.eup %3218 }
 0x430   : > { %v3815_v19 = vmul.f32 %v3219_v14, %v1878_v61 }
 0x431   : > { %v3221_v28 = vpop.eup %3220 }
 0x432   : > { %2013 = vmatprep.mubr.f32.mxu0 %v3815_v19  ;;  %v3820_v15 = vmul.f32 %v3221_v28, %v1879_v3 }
 0x433   : > { %2014 = vmatmul.mubr.f32.vlgmr.msra.gmra.mxu0 %v3817_v53 }
 0x434   : > { %3068 = vmatprep.mubr.msk.f32.mxu0 %vm3298_vm0, %v3297_v55  ;;  %3064 = vmatmul.mubr.f32.vlgmr.msra.gmra.mxu1 %v3820_v15 }
 0x435   : > { %3073 = vmatprep.mubr.msk.f32.mxu1 %vm3298_vm0, %v3297_v55 }
 0x4f3   : > { %v2998_v16 = vpop.f32.mrf.mxu0 }
 0x4f4   : > { %v2085_v17 = vpop.f32.mrf.mxu1 }
 0x4f5   : > { %v2999_v12 = vpop.f32.mrf.mxu0 }
 0x4f6   : > { %v3000_v18 = vadd.f32 %v2999_v12, %v2998_v16  ;;  %v3065_v20 = vpop.f32.mrf.mxu1 }
 0x4f8   : > { %v2086_v21 = vadd.f32 %v3000_v18, %v2085_v17 }
 0x4fa   : > { %2096 = vrot.lane.b32.xlu0 %v2086_v21, %s3294_s24  ;;  %3072 = vmatpush3.msra.mxu1 %v2086_v21  ;;  %v2090_v5 = vsel %vm2089_vm2, %v2086_v21, 0.0  ;;  %s4005_s24 = smov 47  }
 0x4fb   : > { %2091 = vadd.xlane.f32.xlu1 %v2090_v5  ;;  %3074 = vmatmul.mubr.msk.f32.vlgmr.msra.gmra.mxu1 %vm2109_vm3, %v2106_v22 }
 0x4fc   : > { %3081 = vmatprep.subr.mxu1 %v3297_v55  ;;  %3083 = vmatprep.mubr.msk.f32.mxu1 %vm3298_vm0, %v3297_v55 }
 0x4fe   : > { %2101 = vrot.lane.b32.xlu0 %v2086_v21, %s3290_s25  ;;  %s3992_s25 = smov 41  }
 0x502   : > { %2592 = vrot.lane.b32.xlu0 %v2590_v43, %s3991_s27  ;;  %s4002_s27 = smov 43  }
 0x506   : > { %2693 = vrot.lane.b32.xlu0 %v2691_v44, %s3993_s30  ;;  %s3300_s30 = smov 97  }
 0x50a   : > { %2603 = vrot.lane.b32.xlu0 %v2590_v43, %s3995_s15  ;;  %s3302_s15 = smov 81  }
 0x50c   : > { %2726 = vrot.lane.b32.xlu1 %v2691_v44, %s3992_s25  ;;  %s3299_s25 = smov 83  }
 0x50e   : > { %2704 = vrot.lane.b32.xlu0 %v2691_v44, %s3997_s13  ;;  %s3305_s13 = smov 103  }
 0x510   : > { %2663 = vrot.lane.b32.xlu1 %v2590_v43, %s3994_s14  ;;  %s3301_s14 = smov 107  }
 0x512   : > { %2615 = vrot.lane.b32.xlu0 %v2590_v43, %s3998_s28  ;;  %s3306_s28 = smov 91  }
 0x514   : > { %2681 = vrot.lane.b32.xlu1 %v2590_v43, %s3996_s19  ;;  %s3303_s19 = smov 105  }
 0x516   : > { %2715 = vrot.lane.b32.xlu0 %v2691_v44, %s3999_s20  ;;  %s3307_s20 = smov 101  }
 0x51a   : > { %2627 = vrot.lane.b32.xlu0 %v2590_v43, %s4000_s17  ;;  %s3308_s17 = smov 89  }
 0x51e   : > { %2639 = vrot.lane.b32.xlu0 %v2590_v43, %s4001_s16  ;;  %s3309_s16 = smov 99  }
 0x522   : > { %2737 = vrot.lane.b32.xlu0 %v2691_v44, %s4002_s27  ;;  %s3310_s27 = smov 87  }
 0x526   : > { %2748 = vrot.lane.b32.xlu0 %v2691_v44, %s4003_s18  ;;  %s3311_s18 = smov 85  }
 0x52a   : > { %2651 = vrot.lane.b32.xlu0 %v2590_v43, %s4004_s23  ;;  %s3312_s23 = smov 79  }
 0x52e   : > { %2765 = vrot.lane.b32.xlu0 %v2691_v44, %s4005_s24  ;;  %s3313_s24 = smov 95  }
 0x532   : > { %2776 = vrot.lane.b32.xlu0 %v2691_v44, %s4006_s26  ;;  %s4007_s26 = sshll.u32 %s4009_s22, 4 }
 0x56c   : > { %v2097_v6 = vpop.permute.xlu0 %2096 }
 0x56d   : > { %3067 = vmatpush3.msk.msra.mxu0 %vm2099_vm4, %v2097_v6 }
 0x56e   : > { %3076 = vmatprep.subr.mxu0 %v3297_v55  ;;  %3069 = vmatmul.mubr.msk.f32.vlgmr.msra.gmra.mxu0 %vm2109_vm3, %v2942_v23 }
 0x56f   : > { %3078 = vmatprep.mubr.msk.f32.mxu0 %vm3298_vm0, %v3297_v55 }
 0x570   : > { %v2102_v56 = vpop.permute.xlu0 %2101 }
 0x571   : > { %3077 = vmatpush3.msk.msra.mxu0 %vm2947_vm5, %v2102_v56 }
 0x572   : > { %3079 = vmatmul.mubr.msk.f32.vlgmr.msra.gmra.mxu0 %vm2109_vm3, %v2946_v24  ;;  %2953 = vmatprep.subr.msk.mxu0 %vm2436_vm6, %v2431_v32 }
 0x573   : > { %2510 = vmatprep.mubr.f32.mxu0 %v3297_v55  ;;  %2954 = vmatpush1.msk.msra.mxu0 %vm2436_vm6, %v2430_v33 }
 0x574   : > { %2472 = vmatprep.subr.mxu0 %v2428_v35  ;;  %v2593_v9 = vpop.permute.xlu0 %2592 }
 0x575   : > { %2473 = vmatpush1.msra.mxu0 %v2427_v36 }
 0x576   : > { %2474 = vmatprep.subr.mxu0 %v2425_v8 }
 0x577   : > { %2475 = vmatpush1.msra.mxu0 %v2424_v37 }
 0x578   : > { %2476 = vmatprep.subr.mxu0 %v2422_v40  ;;  %v2694_v54 = vpop.permute.xlu0 %2693 }
 0x579   : > { %2477 = vmatpush1.msra.mxu0 %v2421_v41 }
 0x57c   : > { %v2604_v38 = vpop.permute.xlu0 %2603 }
 0x580   : > { %v2705_v29 = vpop.permute.xlu0 %2704 }
 0x584   : > { %v2092_v25 = vpop.xlane.xlu1 %2091  ;;  %v2616_v0 = vpop.permute.xlu0 %2615 }
 0x585   : > { %v2094_v26 = vmul.f32 0.04, %v2092_v25 }
 0x587   : > { %3082 = vmatpush3.msra.mxu1 %v2094_v26 }
 0x588   : > { %3084 = vmatmul.mubr.msk.f32.vlgmr.msra.gmra.mxu1 %vm2109_vm3, %v2332_v27  ;;  %3086 = vmatprep.subr.mxu1 %v3297_v55  ;;  %v2716_v2 = vpop.permute.xlu0 %2715  ;;  %v2727_v28 = vpop.permute.xlu1 %2726 }
 0x589   : > { %3094 = vmatprep.mubr.msk.f32.mxu1 %vm3298_vm0, %v3297_v55  ;;  %3087 = vmatpush3.msk.msra.mxu1 %vm2436_vm6, %v2432_v34 }
 0x58a   : > { %3088 = vmatprep.subr.mxu1 %v3297_v55 }
 0x58b   : > { %3089 = vmatpush3.msra.mxu1 %v2429_v7 }
 0x58c   : > { %3090 = vmatprep.subr.mxu1 %v3297_v55  ;;  %v2628_v10 = vpop.permute.xlu0 %2627  ;;  %v2664_v23 = vpop.permute.xlu1 %2663 }
 0x58d   : > { %3091 = vmatpush3.msra.mxu1 %v2426_v39 }
 0x58e   : > { %3092 = vmatprep.subr.mxu1 %v3297_v55 }
 0x58f   : > { %3093 = vmatpush3.msra.mxu1 %v2423_v42 }
 0x590   : > { %v2640_v11 = vpop.permute.xlu0 %2639  ;;  %v2682_v37 = vpop.permute.xlu1 %2681 }
 0x594   : > { %v2738_v13 = vpop.permute.xlu0 %2737 }
 0x598   : > { %v2749_v14 = vpop.permute.xlu0 %2748 }
 0x59c   : > { %v2652_v22 = vpop.permute.xlu0 %2651 }
 0x5a0   : > { %v2766_v25 = vpop.permute.xlu0 %2765 }
 0x5a4   : > { %v2777_v7 = vpop.permute.xlu0 %2776 }
 0x5bb   : > { %v2252_v30 = vpop.f32.mrf.mxu1 }
 0x5bd   : > { %v3075_v31 = vpop.f32.mrf.mxu1 }
 0x62e   : > { %v2179_v55 = vpop.f32.mrf.mxu0 }
 0x62f   : > { %v2253_v49 = vadd.f32 %v2252_v30, %v2179_v55 }
 0x630   : > { %v3070_v45 = vpop.f32.mrf.mxu0 }
 0x632   : > { %v2327_v46 = vpop.f32.mrf.mxu0 }
 0x633   : > { %v2331_v47 = vadd.f32 %v2327_v46, %v2253_v49 }
 0x634   : > { %v3080_v48 = vpop.f32.mrf.mxu0 }
 0x635   : > { %v2952_v50 = vmul.f32 -1.442695, %v2331_v47 }
 0x637   : > { %3222 = vpow2.f32 %v2952_v50 }
 0x644   : > { %v3223_v59 = vpop.eup %3222 }
 0x645   : > { %v2416_v60 = vadd.f32 1.0, %v3223_v59 }
 0x648   : > { %v2402_v51 = vpop.f32.mrf.mxu1 }
 0x649   : > { %v2951_v52 = vmul.f32 -1.442695, %v2402_v51 }
 0x64a   : > { %v3085_v57 = vpop.f32.mrf.mxu1 }
 0x64b   : > { %3224 = vpow2.f32 %v2951_v52 }
 0x64c   : > { %3226 = vrcp.f32 %v2416_v60 }
 0x658   : > { %v3225_v61 = vpop.eup %3224 }
 0x659   : > { %v2409_v62 = vadd.f32 1.0, %v3225_v61  ;;  %v3227_v58 = vpop.eup %3226 }
 0x65a   : > { %v2419_v1 = vmul.f32 0.5, %v3227_v58 }
 0x65b   : > { %3228 = vrcp.f32 %v2409_v62 }
 0x668   : > { %v3229_v63 = vpop.eup %3228 }
 0x669   : > { %v2412_v3 = vmul.f32 0.5, %v3229_v63 }
 0x66b   : > { %v2420_v4 = vadd.f32 %v2419_v1, %v2412_v3 }
 0x66d   : > { %2955 = vmatmul.mubr.msk.f32.vlgmr.msra.gmra.mxu0 %vm2089_vm2, %v2420_v4  ;;  %3095 = vmatmul.mubr.msk.f32.vlgmr.msra.gmra.mxu1 %vm2089_vm2, %v2420_v4 }
 0x72d   : > { %v2512_v16 = vpop.f32.mrf.mxu0  ;;  %v2583_v17 = vpop.f32.mrf.mxu1 }
 0x72e   : > { %v2587_v12 = vmul.f32 %v2512_v16, %v3817_v53  ;;  %v2589_v18 = vmul.f32 %v2583_v17, %v3820_v15 }
 0x72f   : > { %v3096_v20 = vpop.f32.mrf.mxu1  ;;  %v2514_v24 = vpop.f32.mrf.mxu0 }
 0x730   : > { %v2752_v21 = vadd.f32 %v2749_v14, %v2589_v18  ;;  %v2595_v5 = vadd.f32 %v2593_v9, %v2587_v12  ;;  %v2666_v6 = vadd.f32 %v2664_v23, %v2587_v12  ;;  %v2606_v56 = vadd.f32 %v2604_v38, %v2587_v12 }
 0x731   : > { %v2768_v53 = vadd.f32 %v2766_v25, %v2589_v18  ;;  %v2588_v15 = vmul.f32 %v2514_v24, %v3815_v19  ;;  %v2618_v26 = vadd.f32 %v2616_v0, %v2587_v12  ;;  %v2630_v30 = vadd.f32 %v2628_v10, %v2587_v12 }
 0x732   : > { %2757 = vrot.lane.b32.xlu0 %v2752_v21, %s3299_s25  ;;  %2597 = vrot.lane.b32.xlu1 %v2595_v5, %s3296_s29  ;;  %s3304_s29 = smov 93   ;;  %v2642_v32 = vadd.f32 %v2640_v11, %v2587_v12  ;;  %v2654_v34 = vadd.f32 %v2652_v22, %v2587_v12  ;;  %v2779_v39 = vadd.f32 %v2777_v7, %v2589_v18 }
 0x733   : > { %v2696_v27 = vadd.f32 %v2694_v54, %v2588_v15  ;;  %v2707_v31 = vadd.f32 %v2705_v29, %v2588_v15  ;;  %v2718_v33 = vadd.f32 %v2716_v2, %v2588_v15  ;;  %v2729_v19 = vadd.f32 %v2727_v28, %v2588_v15 }
 0x734   : > { %v2751_v35 = vadd.f32 %v2749_v14, %v2588_v15  ;;  %v2740_v36 = vadd.f32 %v2738_v13, %v2588_v15  ;;  %v2667_v8 = vadd.f32 %v2664_v23, %v2588_v15  ;;  %v2684_v40 = vadd.f32 %v2682_v37, %v2588_v15 }
 0x736   : > { %2670 = vrot.lane.b32.xlu0 %v2666_v6, %s3300_s30  ;;  %2608 = vrot.lane.b32.xlu1 %v2606_v56, %s3301_s14 }
 0x73a   : > { %2770 = vrot.lane.b32.xlu0 %v2768_v53, %s3302_s15  ;;  %2620 = vrot.lane.b32.xlu1 %v2618_v26, %s3303_s19  ;;  %s3930_s19 = scalar_lea.vmem %s3971_s12, %s4007_s26 }
 0x73e   : > { %2698 = vrot.lane.b32.xlu0 %v2696_v27, %s3304_s29  ;;  %2632 = vrot.lane.b32.xlu1 %v2630_v30, %s3305_s13 }
 0x742   : > { %2709 = vrot.lane.b32.xlu0 %v2707_v31, %s3306_s28  ;;  %2644 = vrot.lane.b32.xlu1 %v2642_v32, %s3307_s20 }
 0x746   : > { %2720 = vrot.lane.b32.xlu0 %v2718_v33, %s3308_s17  ;;  %2656 = vrot.lane.b32.xlu1 %v2654_v34, %s3309_s16 }
 0x74a   : > { %2731 = vrot.lane.b32.xlu0 %v2729_v19, %s3310_s27  ;;  %2755 = vrot.lane.b32.xlu1 %v2751_v35, %s3299_s25 }
 0x74e   : > { %2742 = vrot.lane.b32.xlu0 %v2740_v36, %s3311_s18  ;;  %2672 = vrot.lane.b32.xlu1 %v2667_v8, %s3300_s30 }
 0x752   : > { %2781 = vrot.lane.b32.xlu0 %v2779_v39, %s3312_s23  ;;  %2686 = vrot.lane.b32.xlu1 %v2684_v40, %s3313_s24 }
 0x7a4   : > { %v2758_v41 = vpop.permute.xlu0 %2757  ;;  %v2598_v42 = vpop.permute.xlu1 %2597 }
 0x7a5   : > { %2600 = vst.msk [vmem:[%s3930_s19] sm:$0xff] %vm1099_vm8, %v2598_v42 }
 0x7a8   : > { %v2671_v43 = vpop.permute.xlu0 %2670  ;;  %v2609_v44 = vpop.permute.xlu1 %2608 }
 0x7a9   : > { %2612 = vst.msk [vmem:[%s3930_s19] sm:$0xff] %vm2611_vm7, %v2609_v44 }
 0x7ac   : > { %v2771_v55 = vpop.permute.xlu0 %2770  ;;  %v2621_v45 = vpop.permute.xlu1 %2620 }
 0x7ad   : > { %2624 = vst.msk [vmem:[%s3930_s19] sm:$0xff] %vm2623_vm9, %v2621_v45 }
 0x7b0   : > { %v2699_v46 = vpop.permute.xlu0 %2698  ;;  %v2633_v48 = vpop.permute.xlu1 %2632 }
 0x7b1   : > { %2701 = vst.msk [vmem:[%s3930_s19 + $0x8] sm:$0xff] %vm1099_vm8, %v2699_v46  ;;  %vm2759_vm8 = vcmask 678912  }
 0x7b2   : > { %2636 = vst.msk [vmem:[%s3930_s19] sm:$0xff] %vm2635_vm10, %v2633_v48 }
 0x7b4   : > { %v2710_v49 = vpop.permute.xlu0 %2709  ;;  %v2645_v47 = vpop.permute.xlu1 %2644 }
 0x7b5   : > { %2712 = vst.msk [vmem:[%s3930_s19 + $0x8] sm:$0xff] %vm2611_vm7, %v2710_v49 }
 0x7b6   : > { %2648 = vst.msk [vmem:[%s3930_s19] sm:$0xff] %vm2647_vm11, %v2645_v47 }
 0x7b8   : > { %v2721_v50 = vpop.permute.xlu0 %2720  ;;  %v2657_v51 = vpop.permute.xlu1 %2656 }
 0x7b9   : > { %2723 = vst.msk [vmem:[%s3930_s19 + $0x8] sm:$0xff] %vm2623_vm9, %v2721_v50 }
 0x7ba   : > { %2660 = vst.msk [vmem:[%s3930_s19] sm:$0xff] %vm2659_vm12, %v2657_v51 }
 0x7bc   : > { %v2732_v52 = vpop.permute.xlu0 %2731  ;;  %v2756_v57 = vpop.permute.xlu1 %2755 }
 0x7bd   : > { %2734 = vst.msk [vmem:[%s3930_s19 + $0x8] sm:$0xff] %vm2635_vm10, %v2732_v52  ;;  %v2760_v60 = vsel %vm2759_vm8, %v2756_v57, %v2758_v41 }
 0x7c0   : > { %v2743_v59 = vpop.permute.xlu0 %2742  ;;  %v2673_v61 = vpop.permute.xlu1 %2672 }
 0x7c1   : > { %2745 = vst.msk [vmem:[%s3930_s19 + $0x8] sm:$0xff] %vm2647_vm11, %v2743_v59  ;;  %v2675_v62 = vsel %vm2674_vm13, %v2671_v43, %v2673_v61 }
 0x7c2   : > { %2762 = vst.msk [vmem:[%s3930_s19 + $0x8] sm:$0xff] %vm2659_vm12, %v2760_v60 }
 0x7c3   : > { %2678 = vst.msk [vmem:[%s3930_s19] sm:$0xff] %vm2677_vm14, %v2675_v62  ;;  %2773 = vst.msk [vmem:[%s3930_s19 + $0x8] sm:$0xff] %vm2677_vm14, %v2771_v55 }
 0x7c4   : > { %v2782_v58 = vpop.permute.xlu0 %2781  ;;  %v2687_v63 = vpop.permute.xlu1 %2686 }
 0x7c5   : > { %2784 = vst.msk [vmem:[%s3930_s19 + $0x8] sm:$0xff] %vm2689_vm15, %v2782_v58  ;;  %2690 = vst.msk [vmem:[%s3930_s19] sm:$0xff] %vm2689_vm15, %v2687_v63 }
 0x7c6 PF: > { %s23_s21 = sadd.s32 1, %s3268_s21  }
 0x7c7   : > { %p20_p1 = scmp.ge.s32.totalorder %s23_s21, 4  }
 0x7c9   :  { %22 = sbr.rel (!%p20_p1) target bundleno = 1 (0x1), region = 105 }
 0x7ce   :  { %2806 = vsyncpa [#allocation6], 1 }
 0x7cf   :  { %2808 = vsyncpa [#allocation6 + $0x1], 1 }

</bundles_post_ra>
